<compile_context>
chip_gen: v6e
topology: v6e:2x2x1
jax: 0.10.0
libtpu: 0.0.40
codegen_flags: <defaults>
</compile_context>

<pallas_src>
import math
import jax
import jax.numpy as jnp
from jax.experimental import pallas as pl
from jax.experimental.pallas import tpu as pltpu


def make_kernel(f_real, nh):
    """Per-grid-step kernel; f_real = true feature count, nh = hidden width."""
    inv_f = 1.0 / float(f_real)

    def encoder_kernel(x_ref,
                       w00, csum00, b00, w01, b01,    # encoder[0] + colsum(W00)
                       w10f, b10, w11, b11,           # encoder[1] (einpool fused)
                       tw0, tb0, tw1, tb1,            # t: MLP(nh -> nh2 -> 2)
                       out_ref):
        SB, N, F = x_ref.shape
        M = SB * N

        # Flatten SB sets into one big M dimension for all matmuls.
        x = x_ref[...].reshape(M, F)

        # Row statistics — the only full-width passes over x besides the matmul.
        rowsum = jnp.sum(x, axis=-1, keepdims=True)                 # (M, 1)
        sqsum = jnp.sum(x * x, axis=-1, keepdims=True)              # (M, 1)
        mean = rowsum * inv_f
        ss = sqsum - rowsum * mean                                  # sum((x-mean)^2)
        # F.normalize eps: x / max(||x||, 1e-12) == x * rsqrt(max(||x||^2, 1e-24))
        scale = 20.0 * jax.lax.rsqrt(jnp.maximum(ss, 1e-24))        # EUP slot

        # encoder[0]: Linear(F,nh) -> relu -> Linear(nh,nh), with the centering
        # + L2 normalization applied AFTER the matmul:
        #   ((x - mean) * scale) @ W00 = scale * (x @ W00 - mean * colsum(W00))
        xw = jnp.dot(x, w00[...], preferred_element_type=jnp.float32)          # (M, nh)
        h = jnp.maximum(scale * (xw - mean * csum00[...]) + b00[...], 0.0)
        h = jnp.dot(h, w01[...], preferred_element_type=jnp.float32) + b01[...]  # (M, nh)

        # encoder[1] with the equivariant einpool over the set axis on sin(h).
        # TODO(synk): exact perm_inv.einpool(form='X_BaH', order=3) basis is
        # library-specific; the canonical single-axis equivariant basis
        # (identity, set-mean) => k = 2 is used, matching `reference` below.
        # Fused:  pooled @ W10 = (p @ W10f)[..., :nh] + mean_N((p @ W10f)[..., nh:])
        p = jnp.sin(h)
        pw = jnp.dot(p, w10f[...], preferred_element_type=jnp.float32)          # (M, 2nh)
        pw = pw.reshape(SB, N, 2 * nh)
        pwm = jnp.mean(pw, axis=1, keepdims=True)                                # (SB,1,2nh)
        h = jnp.maximum(pw[:, :, :nh] + pwm[:, :, nh:] + b10[...], 0.0)
        h = h.reshape(M, nh)
        h = jnp.dot(h, w11[...], preferred_element_type=jnp.float32) + b11[...]  # (M, nh)

        # Invariant mean over the set axis -> one vector per set.
        hm = jnp.mean(h.reshape(SB, N, nh), axis=1)                              # (SB, nh)

        # t: Linear(nh,nh2) -> relu -> Linear(nh2,2)
        t = jnp.maximum(
            jnp.dot(hm, tw0[...], preferred_element_type=jnp.float32) + tb0[...], 0.0)
        out = jnp.dot(t, tw1[...], preferred_element_type=jnp.float32) + tb1[...]
        out_ref[...] = out.astype(out_ref.dtype)                                 # (SB, 2)

    return encoder_kernel


def forward_pallas(x, params, set_block=None):
    S, N, F = x.shape
    (w00, b00, w01, b01, w10, b10, w11, b11, tw0, tb0, tw1, tb1) = params
    nh = w01.shape[1]
    nh2 = tw0.shape[1]

    # Wrapper-side weight prep (tiny, one-time):
    #  * colsum(W00) for the post-matmul centering identity.
    #  * einpool weight halves fused side-by-side into one (nh, 2*nh) weight.
    csum00 = jnp.sum(w00, axis=0, keepdims=True)                # (1, nh)
    w10f = jnp.concatenate([w10[:nh], w10[nh:]], axis=1)        # (nh, 2*nh)

    # Set-block size: multiple of 8, >= 4 grid steps when S permits (>= 2 per
    # v7x TensorCore), block small enough for v5e's 16 MiB scoped-VMEM default.
    if set_block is None:
        sb = max(8, min(128, pl.cdiv(S, 4)))
        set_block = pl.cdiv(sb, 8) * 8
    SB = set_block

    # Pad S up to a multiple of SB with zero sets (sliced off the output; zero
    # rows stay finite through the rsqrt path).  The feature dim stays at the
    # true 400 — no 400->512 pad, no extra HBM copy of x.
    S_pad = pl.cdiv(S, SB) * SB
    x_p = jnp.pad(x, ((0, S_pad - S), (0, 0), (0, 0))) if S_pad != S else x

    kernel = make_kernel(F, nh)

    def _rep(shape):
        zeros = (0,) * len(shape)
        return pl.BlockSpec(shape, lambda s, _z=zeros: _z)   # replicated full-array block

    weights = (w00, csum00, b00, w01, b01, w10f, b10, w11, b11,
               tw0, tb0, tw1, tb1)
    in_specs = [pl.BlockSpec((SB, N, F), lambda s: (s, 0, 0))]
    in_specs += [_rep(tuple(w.shape)) for w in weights]
    out_specs = pl.BlockSpec((SB, 2), lambda s: (s, 0))

    # Advisory cost estimate for XLA scheduling around the custom call.
    M = S_pad * N
    flops = 2 * M * (F * nh + nh * nh + nh * 2 * nh + nh * nh) \
        + 2 * S_pad * (nh * nh2 + nh2 * 2)
    transcendentals = M * nh + M                               # sin + rsqrt
    bytes_accessed = 4 * (int(x_p.size) + sum(int(w.size) for w in weights)
                          + S_pad * 2)
    cost = pl.CostEstimate(flops=int(flops),
                           transcendentals=int(transcendentals),
                           bytes_accessed=int(bytes_accessed))

    # NOTE: a bf16 x / w00 path would halve the dominant HBM bytes (biggest win
    # on v5e) but is skipped to hold the 1e-4 f32 parity tolerance.
    out = pl.pallas_call(
        kernel,
        out_shape=jax.ShapeDtypeStruct((S_pad, 2), jnp.float32),
        grid=(S_pad // SB,),
        in_specs=in_specs,
        out_specs=out_specs,
        compiler_params=pltpu.CompilerParams(dimension_semantics=("parallel",)),
        cost_estimate=cost,
    )(x_p, *weights)
    return out[:S]


def reference(x, params):
    (w00, b00, w01, b01, w10, b10, w11, b11, tw0, tb0, tw1, tb1) = params
    x = x - jnp.mean(x, axis=-1, keepdims=True)
    nrm = jnp.sqrt(jnp.sum(x * x, axis=-1, keepdims=True))
    x = x / jnp.maximum(nrm, 1e-12) * 20.0
    h = jnp.maximum(x @ w00 + b00, 0.0)
    h = h @ w01 + b01
    p = jnp.sin(h)
    pm = jnp.broadcast_to(jnp.mean(p, axis=1, keepdims=True), p.shape)
    pooled = jnp.concatenate([p, pm], axis=-1)
    h = jnp.maximum(pooled @ w10 + b10, 0.0)
    h = h @ w11 + b11
    hm = jnp.mean(h, axis=1)
    t = jnp.maximum(hm @ tw0 + tb0, 0.0)
    return t @ tw1 + tb1


def init_linear(key, fan_in, fan_out):
    # Matches torch.nn.Linear default init: U(-1/sqrt(fan_in), 1/sqrt(fan_in)).
    kw, kb = jax.random.split(key)
    bound = 1.0 / math.sqrt(fan_in)
    w = jax.random.uniform(kw, (fan_in, fan_out), jnp.float32, -bound, bound)
    b = jax.random.uniform(kb, (1, fan_out), jnp.float32, -bound, bound)
    return w, b


if __name__ == "__main__":
    key = jax.random.PRNGKey(0)
    S, N, F = 4, 8, 400          # 4 sets of 8 feature-vectors of dim 400
    nh, nh2, k = 32, 32, 2       # nlayers=2, nlayers2=2, einpool k=2

    keys = jax.random.split(key, 8)
    w00, b00 = init_linear(keys[0], F, nh)
    w01, b01 = init_linear(keys[1], nh, nh)
    w10, b10 = init_linear(keys[2], nh * k, nh)
    w11, b11 = init_linear(keys[3], nh, nh)
    tw0, tb0 = init_linear(keys[4], nh, nh2)
    tw1, tb1 = init_linear(keys[5], nh2, 2)
    params = (w00, b00, w01, b01, w10, b10, w11, b11, tw0, tb0, tw1, tb1)

    x = jax.random.normal(keys[6], (S, N, F), jnp.float32)
    # eval-mode random row permutation (output is permutation invariant)
    perm = jax.random.permutation(keys[7], N)
    x = x[:, perm, :]

    out = jax.block_until_ready(forward_pallas(x, params))
    ref = reference(x, params)
    assert out.shape == (S, 2)
    assert jnp.allclose(out, ref, atol=1e-4, rtol=1e-4), (out, ref)
    print("KERNEL_OK")
</pallas_src>

<mosaic_0001>
module attributes {stable_mosaic.version = 11 : i64} {
  func.func @encoder_kernel(%arg0: i32, %arg1: memref<8x8x400xf32, #tpu.memory_space<vmem>>, %arg2: memref<400x32xf32, #tpu.memory_space<vmem>>, %arg3: memref<1x32xf32, #tpu.memory_space<vmem>>, %arg4: memref<1x32xf32, #tpu.memory_space<vmem>>, %arg5: memref<32x32xf32, #tpu.memory_space<vmem>>, %arg6: memref<1x32xf32, #tpu.memory_space<vmem>>, %arg7: memref<32x64xf32, #tpu.memory_space<vmem>>, %arg8: memref<1x32xf32, #tpu.memory_space<vmem>>, %arg9: memref<32x32xf32, #tpu.memory_space<vmem>>, %arg10: memref<1x32xf32, #tpu.memory_space<vmem>>, %arg11: memref<32x32xf32, #tpu.memory_space<vmem>>, %arg12: memref<1x32xf32, #tpu.memory_space<vmem>>, %arg13: memref<32x2xf32, #tpu.memory_space<vmem>>, %arg14: memref<1x2xf32, #tpu.memory_space<vmem>>, %arg15: memref<8x2xf32, #tpu.memory_space<vmem>>) attributes {dimension_semantics = [#tpu.dimension_semantics<parallel>], iteration_bounds = array<i64: 1>, scalar_prefetch = 0 : i64, scratch_operands = 0 : i64, tpu.core_type = #tpu.core_type<tc>, window_params = [{transform_indices = @transform_0, window_bounds = array<i64: 8, 8, 400>}, {pipeline_mode = #tpu.pipeline_mode<synchronous>, transform_indices = @transform_1, window_bounds = array<i64: 400, 32>}, {pipeline_mode = #tpu.pipeline_mode<synchronous>, transform_indices = @transform_2, window_bounds = array<i64: 1, 32>}, {pipeline_mode = #tpu.pipeline_mode<synchronous>, transform_indices = @transform_3, window_bounds = array<i64: 1, 32>}, {pipeline_mode = #tpu.pipeline_mode<synchronous>, transform_indices = @transform_4, window_bounds = array<i64: 32, 32>}, {pipeline_mode = #tpu.pipeline_mode<synchronous>, transform_indices = @transform_5, window_bounds = array<i64: 1, 32>}, {pipeline_mode = #tpu.pipeline_mode<synchronous>, transform_indices = @transform_6, window_bounds = array<i64: 32, 64>}, {pipeline_mode = #tpu.pipeline_mode<synchronous>, transform_indices = @transform_7, window_bounds = array<i64: 1, 32>}, {pipeline_mode = #tpu.pipeline_mode<synchronous>, transform_indices = @transform_8, window_bounds = array<i64: 32, 32>}, {pipeline_mode = #tpu.pipeline_mode<synchronous>, transform_indices = @transform_9, window_bounds = array<i64: 1, 32>}, {pipeline_mode = #tpu.pipeline_mode<synchronous>, transform_indices = @transform_10, window_bounds = array<i64: 32, 32>}, {pipeline_mode = #tpu.pipeline_mode<synchronous>, transform_indices = @transform_11, window_bounds = array<i64: 1, 32>}, {pipeline_mode = #tpu.pipeline_mode<synchronous>, transform_indices = @transform_12, window_bounds = array<i64: 32, 2>}, {pipeline_mode = #tpu.pipeline_mode<synchronous>, transform_indices = @transform_13, window_bounds = array<i64: 1, 2>}, {transform_indices = @transform_14, window_bounds = array<i64: 8, 2>}]} {
    %c0 = arith.constant 0 : index
    %c0_0 = arith.constant 0 : index
    %c0_1 = arith.constant 0 : index
    %0 = vector.load %arg1[%c0, %c0_0, %c0_1] : memref<8x8x400xf32, #tpu.memory_space<vmem>>, vector<8x8x400xf32>
    %1 = vector.shape_cast %0 : vector<8x8x400xf32> to vector<64x400xf32>
    %cst = arith.constant dense<0.000000e+00> : vector<64xf32>
    %2 = vector.multi_reduction <add>, %1, %cst [1] : vector<64x400xf32> to vector<64xf32>
    %3 = vector.shape_cast %2 : vector<64xf32> to vector<64x1xf32>
    %4 = arith.mulf %1, %1 : vector<64x400xf32>
    %cst_2 = arith.constant dense<0.000000e+00> : vector<64xf32>
    %5 = vector.multi_reduction <add>, %4, %cst_2 [1] : vector<64x400xf32> to vector<64xf32>
    %6 = vector.shape_cast %5 : vector<64xf32> to vector<64x1xf32>
    %cst_3 = arith.constant 2.500000e-03 : f32
    %7 = vector.broadcast %cst_3 : f32 to vector<64x1xf32>
    %8 = arith.mulf %3, %7 : vector<64x1xf32>
    %9 = arith.mulf %3, %8 : vector<64x1xf32>
    %10 = arith.subf %6, %9 : vector<64x1xf32>
    %cst_4 = arith.constant 1.000000e-24 : f32
    %11 = vector.broadcast %cst_4 : f32 to vector<64x1xf32>
    %12 = arith.maximumf %10, %11 : vector<64x1xf32>
    %13 = math.rsqrt %12 : vector<64x1xf32>
    %cst_5 = arith.constant 2.000000e+01 : f32
    %14 = vector.broadcast %cst_5 : f32 to vector<64x1xf32>
    %15 = arith.mulf %14, %13 : vector<64x1xf32>
    %c0_6 = arith.constant 0 : index
    %c0_7 = arith.constant 0 : index
    %16 = vector.load %arg2[%c0_6, %c0_7] : memref<400x32xf32, #tpu.memory_space<vmem>>, vector<400x32xf32>
    %cst_8 = arith.constant dense<0.000000e+00> : vector<64x32xf32>
    %17 = tpu.matmul %1, %16, %cst_8 {dimension_numbers = #tpu.dot_dimension_numbers<[1], [0], [0], [1], [0, 0, 1, 1], [], []>} : vector<64x400xf32>, vector<400x32xf32>, vector<64x32xf32> -> vector<64x32xf32>
    %c0_9 = arith.constant 0 : index
    %c0_10 = arith.constant 0 : index
    %18 = vector.load %arg3[%c0_9, %c0_10] : memref<1x32xf32, #tpu.memory_space<vmem>>, vector<1x32xf32>
    %19 = vector.broadcast %8 : vector<64x1xf32> to vector<64x32xf32>
    %20 = vector.broadcast %18 : vector<1x32xf32> to vector<64x32xf32>
    %21 = arith.mulf %19, %20 : vector<64x32xf32>
    %22 = arith.subf %17, %21 : vector<64x32xf32>
    %23 = vector.broadcast %15 : vector<64x1xf32> to vector<64x32xf32>
    %24 = arith.mulf %23, %22 : vector<64x32xf32>
    %c0_11 = arith.constant 0 : index
    %c0_12 = arith.constant 0 : index
    %25 = vector.load %arg4[%c0_11, %c0_12] : memref<1x32xf32, #tpu.memory_space<vmem>>, vector<1x32xf32>
    %26 = vector.broadcast %25 : vector<1x32xf32> to vector<64x32xf32>
    %27 = arith.addf %24, %26 : vector<64x32xf32>
    %cst_13 = arith.constant 0.000000e+00 : f32
    %28 = vector.broadcast %cst_13 : f32 to vector<64x32xf32>
    %29 = arith.maximumf %27, %28 : vector<64x32xf32>
    %c0_14 = arith.constant 0 : index
    %c0_15 = arith.constant 0 : index
    %30 = vector.load %arg5[%c0_14, %c0_15] : memref<32x32xf32, #tpu.memory_space<vmem>>, vector<32x32xf32>
    %cst_16 = arith.constant dense<0.000000e+00> : vector<64x32xf32>
    %31 = tpu.matmul %29, %30, %cst_16 {dimension_numbers = #tpu.dot_dimension_numbers<[1], [0], [0], [1], [0, 0, 1, 1], [], []>} : vector<64x32xf32>, vector<32x32xf32>, vector<64x32xf32> -> vector<64x32xf32>
    %c0_17 = arith.constant 0 : index
    %c0_18 = arith.constant 0 : index
    %32 = vector.load %arg6[%c0_17, %c0_18] : memref<1x32xf32, #tpu.memory_space<vmem>>, vector<1x32xf32>
    %33 = vector.broadcast %32 : vector<1x32xf32> to vector<64x32xf32>
    %34 = arith.addf %31, %33 : vector<64x32xf32>
    %35 = math.sin %34 : vector<64x32xf32>
    %c0_19 = arith.constant 0 : index
    %c0_20 = arith.constant 0 : index
    %36 = vector.load %arg7[%c0_19, %c0_20] : memref<32x64xf32, #tpu.memory_space<vmem>>, vector<32x64xf32>
    %cst_21 = arith.constant dense<0.000000e+00> : vector<64x64xf32>
    %37 = tpu.matmul %35, %36, %cst_21 {dimension_numbers = #tpu.dot_dimension_numbers<[1], [0], [0], [1], [0, 0, 1, 1], [], []>} : vector<64x32xf32>, vector<32x64xf32>, vector<64x64xf32> -> vector<64x64xf32>
    %38 = vector.shape_cast %37 : vector<64x64xf32> to vector<8x8x64xf32>
    %cst_22 = arith.constant dense<0.000000e+00> : vector<8x64xf32>
    %39 = vector.multi_reduction <add>, %38, %cst_22 [1] : vector<8x8x64xf32> to vector<8x64xf32>
    %40 = vector.shape_cast %39 : vector<8x64xf32> to vector<8x1x64xf32>
    %cst_23 = arith.constant 8.000000e+00 : f32
    %41 = vector.broadcast %cst_23 : f32 to vector<8x1x64xf32>
    %42 = arith.divf %40, %41 : vector<8x1x64xf32>
    %43 = vector.extract_strided_slice %38 {offsets = [0, 0, 0], sizes = [8, 8, 32], strides = [1, 1, 1]} : vector<8x8x64xf32> to vector<8x8x32xf32>
    %44 = vector.extract_strided_slice %42 {offsets = [0, 0, 32], sizes = [8, 1, 32], strides = [1, 1, 1]} : vector<8x1x64xf32> to vector<8x1x32xf32>
    %45 = vector.broadcast %44 : vector<8x1x32xf32> to vector<8x8x32xf32>
    %46 = arith.addf %43, %45 : vector<8x8x32xf32>
    %c0_24 = arith.constant 0 : index
    %c0_25 = arith.constant 0 : index
    %47 = vector.load %arg8[%c0_24, %c0_25] : memref<1x32xf32, #tpu.memory_space<vmem>>, vector<1x32xf32>
    %48 = vector.shape_cast %47 : vector<1x32xf32> to vector<1x1x32xf32>
    %49 = vector.broadcast %48 : vector<1x1x32xf32> to vector<8x8x32xf32>
    %50 = arith.addf %46, %49 : vector<8x8x32xf32>
    %cst_26 = arith.constant 0.000000e+00 : f32
    %51 = vector.broadcast %cst_26 : f32 to vector<8x8x32xf32>
    %52 = arith.maximumf %50, %51 : vector<8x8x32xf32>
    %53 = vector.shape_cast %52 : vector<8x8x32xf32> to vector<64x32xf32>
    %c0_27 = arith.constant 0 : index
    %c0_28 = arith.constant 0 : index
    %54 = vector.load %arg9[%c0_27, %c0_28] : memref<32x32xf32, #tpu.memory_space<vmem>>, vector<32x32xf32>
    %cst_29 = arith.constant dense<0.000000e+00> : vector<64x32xf32>
    %55 = tpu.matmul %53, %54, %cst_29 {dimension_numbers = #tpu.dot_dimension_numbers<[1], [0], [0], [1], [0, 0, 1, 1], [], []>} : vector<64x32xf32>, vector<32x32xf32>, vector<64x32xf32> -> vector<64x32xf32>
    %c0_30 = arith.constant 0 : index
    %c0_31 = arith.constant 0 : index
    %56 = vector.load %arg10[%c0_30, %c0_31] : memref<1x32xf32, #tpu.memory_space<vmem>>, vector<1x32xf32>
    %57 = vector.broadcast %56 : vector<1x32xf32> to vector<64x32xf32>
    %58 = arith.addf %55, %57 : vector<64x32xf32>
    %59 = vector.shape_cast %58 : vector<64x32xf32> to vector<8x8x32xf32>
    %cst_32 = arith.constant dense<0.000000e+00> : vector<8x32xf32>
    %60 = vector.multi_reduction <add>, %59, %cst_32 [1] : vector<8x8x32xf32> to vector<8x32xf32>
    %cst_33 = arith.constant 8.000000e+00 : f32
    %61 = vector.broadcast %cst_33 : f32 to vector<8x32xf32>
    %62 = arith.divf %60, %61 : vector<8x32xf32>
    %c0_34 = arith.constant 0 : index
    %c0_35 = arith.constant 0 : index
    %63 = vector.load %arg11[%c0_34, %c0_35] : memref<32x32xf32, #tpu.memory_space<vmem>>, vector<32x32xf32>
    %cst_36 = arith.constant dense<0.000000e+00> : vector<8x32xf32>
    %64 = tpu.matmul %62, %63, %cst_36 {dimension_numbers = #tpu.dot_dimension_numbers<[1], [0], [0], [1], [0, 0, 1, 1], [], []>} : vector<8x32xf32>, vector<32x32xf32>, vector<8x32xf32> -> vector<8x32xf32>
    %c0_37 = arith.constant 0 : index
    %c0_38 = arith.constant 0 : index
    %65 = vector.load %arg12[%c0_37, %c0_38] : memref<1x32xf32, #tpu.memory_space<vmem>>, vector<1x32xf32>
    %66 = vector.broadcast %65 : vector<1x32xf32> to vector<8x32xf32>
    %67 = arith.addf %64, %66 : vector<8x32xf32>
    %cst_39 = arith.constant 0.000000e+00 : f32
    %68 = vector.broadcast %cst_39 : f32 to vector<8x32xf32>
    %69 = arith.maximumf %67, %68 : vector<8x32xf32>
    %c0_40 = arith.constant 0 : index
    %c0_41 = arith.constant 0 : index
    %70 = vector.load %arg13[%c0_40, %c0_41] : memref<32x2xf32, #tpu.memory_space<vmem>>, vector<32x2xf32>
    %cst_42 = arith.constant dense<0.000000e+00> : vector<8x2xf32>
    %71 = tpu.matmul %69, %70, %cst_42 {dimension_numbers = #tpu.dot_dimension_numbers<[1], [0], [0], [1], [0, 0, 1, 1], [], []>} : vector<8x32xf32>, vector<32x2xf32>, vector<8x2xf32> -> vector<8x2xf32>
    %c0_43 = arith.constant 0 : index
    %c0_44 = arith.constant 0 : index
    %72 = vector.load %arg14[%c0_43, %c0_44] : memref<1x2xf32, #tpu.memory_space<vmem>>, vector<1x2xf32>
    %73 = vector.broadcast %72 : vector<1x2xf32> to vector<8x2xf32>
    %74 = arith.addf %71, %73 : vector<8x2xf32>
    %c0_45 = arith.constant 0 : index
    %c0_46 = arith.constant 0 : index
    %75 = vector.load %arg15[%c0_45, %c0_46] : memref<8x2xf32, #tpu.memory_space<vmem>>, vector<8x2xf32>
    tpu.vector_store %arg15[%c0_45, %c0_46], %74 {strides = array<i32>} : memref<8x2xf32, #tpu.memory_space<vmem>>, vector<8x2xf32>,
    return
  }
  func.func @transform_0(%arg0: i32) -> (i32, i32, i32) {
    %c0_i32 = arith.constant 0 : i32
    %c0_i32_0 = arith.constant 0 : i32
    %c0_i32_1 = arith.constant 0 : i32
    return %arg0, %c0_i32, %c0_i32_0 : i32, i32, i32
  }
  func.func @transform_1(%arg0: i32) -> (i32, i32) {
    %c0_i32 = arith.constant 0 : i32
    %c0_i32_0 = arith.constant 0 : i32
    %c0_i32_1 = arith.constant 0 : i32
    return %c0_i32, %c0_i32_0 : i32, i32
  }
  func.func @transform_2(%arg0: i32) -> (i32, i32) {
    %c0_i32 = arith.constant 0 : i32
    %c0_i32_0 = arith.constant 0 : i32
    %c0_i32_1 = arith.constant 0 : i32
    return %c0_i32, %c0_i32_0 : i32, i32
  }
  func.func @transform_3(%arg0: i32) -> (i32, i32) {
    %c0_i32 = arith.constant 0 : i32
    %c0_i32_0 = arith.constant 0 : i32
    %c0_i32_1 = arith.constant 0 : i32
    return %c0_i32, %c0_i32_0 : i32, i32
  }
  func.func @transform_4(%arg0: i32) -> (i32, i32) {
    %c0_i32 = arith.constant 0 : i32
    %c0_i32_0 = arith.constant 0 : i32
    %c0_i32_1 = arith.constant 0 : i32
    return %c0_i32, %c0_i32_0 : i32, i32
  }
  func.func @transform_5(%arg0: i32) -> (i32, i32) {
    %c0_i32 = arith.constant 0 : i32
    %c0_i32_0 = arith.constant 0 : i32
    %c0_i32_1 = arith.constant 0 : i32
    return %c0_i32, %c0_i32_0 : i32, i32
  }
  func.func @transform_6(%arg0: i32) -> (i32, i32) {
    %c0_i32 = arith.constant 0 : i32
    %c0_i32_0 = arith.constant 0 : i32
    %c0_i32_1 = arith.constant 0 : i32
    return %c0_i32, %c0_i32_0 : i32, i32
  }
  func.func @transform_7(%arg0: i32) -> (i32, i32) {
    %c0_i32 = arith.constant 0 : i32
    %c0_i32_0 = arith.constant 0 : i32
    %c0_i32_1 = arith.constant 0 : i32
    return %c0_i32, %c0_i32_0 : i32, i32
  }
  func.func @transform_8(%arg0: i32) -> (i32, i32) {
    %c0_i32 = arith.constant 0 : i32
    %c0_i32_0 = arith.constant 0 : i32
    %c0_i32_1 = arith.constant 0 : i32
    return %c0_i32, %c0_i32_0 : i32, i32
  }
  func.func @transform_9(%arg0: i32) -> (i32, i32) {
    %c0_i32 = arith.constant 0 : i32
    %c0_i32_0 = arith.constant 0 : i32
    %c0_i32_1 = arith.constant 0 : i32
    return %c0_i32, %c0_i32_0 : i32, i32
  }
  func.func @transform_10(%arg0: i32) -> (i32, i32) {
    %c0_i32 = arith.constant 0 : i32
    %c0_i32_0 = arith.constant 0 : i32
    %c0_i32_1 = arith.constant 0 : i32
    return %c0_i32, %c0_i32_0 : i32, i32
  }
  func.func @transform_11(%arg0: i32) -> (i32, i32) {
    %c0_i32 = arith.constant 0 : i32
    %c0_i32_0 = arith.constant 0 : i32
    %c0_i32_1 = arith.constant 0 : i32
    return %c0_i32, %c0_i32_0 : i32, i32
  }
  func.func @transform_12(%arg0: i32) -> (i32, i32) {
    %c0_i32 = arith.constant 0 : i32
    %c0_i32_0 = arith.constant 0 : i32
    %c0_i32_1 = arith.constant 0 : i32
    return %c0_i32, %c0_i32_0 : i32, i32
  }
  func.func @transform_13(%arg0: i32) -> (i32, i32) {
    %c0_i32 = arith.constant 0 : i32
    %c0_i32_0 = arith.constant 0 : i32
    %c0_i32_1 = arith.constant 0 : i32
    return %c0_i32, %c0_i32_0 : i32, i32
  }
  func.func @transform_14(%arg0: i32) -> (i32, i32) {
    %c0_i32 = arith.constant 0 : i32
    %c0_i32_0 = arith.constant 0 : i32
    return %arg0, %c0_i32 : i32, i32
  }
}

</mosaic_0001>

<bundles_post_ra>
// kernel: tpu_custom_call.1
= control target key start
LH: loop header
LB: loop body
LE: loop exit
PB: predicated region body
PF: predicated region fallthrough
CT: control target
= control target key end

     0   :  { %v3917_v0 = vmov 0.0   ;;  %vm81_vm0 = vcmask 130048   ;;  %vm605_vm1 = vcmask 261120   ;;  %s2582_s20 = smov 96   ;;  %s3902_s1 = inlined_call_operand.vmem [shape: f32[400,32], index: 1, kind: input, shape index: {}]   ;;  %s3903_s0 = inlined_call_operand.vmem [shape: f32[8,8,400], index: 0, kind: input, shape index: {}]   ;;  %s3904_s4 = inlined_call_operand.vmem [shape: f32[32,32], index: 4, kind: input, shape index: {}]   ;;  %s3905_s2 = inlined_call_operand.vmem [shape: f32[1,32], index: 2, kind: input, shape index: {}]   ;;  %s3906_s3 = inlined_call_operand.vmem [shape: f32[1,32], index: 3, kind: input, shape index: {}]   ;;  %s3907_s5 = inlined_call_operand.vmem [shape: f32[1,32], index: 5, kind: input, shape index: {}]   ;;  %s3908_s6 = inlined_call_operand.vmem [shape: f32[32,64], index: 6, kind: input, shape index: {}]   ;;  %s3909_s8 = inlined_call_operand.vmem [shape: f32[32,32], index: 8, kind: input, shape index: {}]   ;;  %s3910_s7 = inlined_call_operand.vmem [shape: f32[1,32], index: 7, kind: input, shape index: {}]   ;;  %s3911_s10 = inlined_call_operand.vmem [shape: f32[32,32], index: 10, kind: input, shape index: {}]   ;;  %s3912_s9 = inlined_call_operand.vmem [shape: f32[1,32], index: 9, kind: input, shape index: {}]   ;;  %s3913_s12 = inlined_call_operand.vmem [shape: f32[32,2], index: 12, kind: input, shape index: {}]   ;;  %s3914_s11 = inlined_call_operand.vmem [shape: f32[1,32], index: 11, kind: input, shape index: {}]   ;;  %s3915_s13 = inlined_call_operand.vmem [shape: f32[1,2], index: 13, kind: input, shape index: {}]   ;;  %s3916_s14 = inlined_call_operand.vmem [shape: f32[8,2], index: 14, kind: output, shape index: {}]  }
   0x1   :  { %435 = vmatprep.subr.mxu1 %v3917_v0  ;;  %v287_v1 = vld [vmem:[%s3902_s1 + $0xf8] sm:$0xff]  ;;  %v286_v4 = vld [vmem:[%s3902_s1 + $0xf0] sm:$0xff]  ;;  %v285_v7 = vld [vmem:[%s3902_s1 + $0xe8] sm:$0xff] }
   0x2   :  { %v303_v2 = vld [vmem:[%s3902_s1 + $0x178] sm:$0xff]  ;;  %2302 = vmatprep.subr.mxu0 %v287_v1  ;;  %v302_v5 = vld [vmem:[%s3902_s1 + $0x170] sm:$0xff]  ;;  %v301_v8 = vld [vmem:[%s3902_s1 + $0x168] sm:$0xff] }
   0x3   :  { %v271_v3 = vld [vmem:[%s3902_s1 + $0x78] sm:$0xff]  ;;  %436 = vmatpush1.msra.mxu1 %v303_v2  ;;  %v270_v6 = vld [vmem:[%s3902_s1 + $0x70] sm:$0xff]  ;;  %v269_v9 = vld [vmem:[%s3902_s1 + $0x68] sm:$0xff] }
   0x4   :  { %2303 = vmatpush3.msra.mxu0 %v271_v3  ;;  %437 = vmatprep.subr.mxu1 %v3917_v0  ;;  %v284_v10 = vld [vmem:[%s3902_s1 + $0xe0] sm:$0xff]  ;;  %v283_v13 = vld [vmem:[%s3902_s1 + $0xd8] sm:$0xff]  ;;  %v282_v16 = vld [vmem:[%s3902_s1 + $0xd0] sm:$0xff] }
   0x5   :  { %2304 = vmatprep.subr.mxu0 %v286_v4  ;;  %438 = vmatpush1.msra.mxu1 %v302_v5  ;;  %v300_v11 = vld [vmem:[%s3902_s1 + $0x160] sm:$0xff]  ;;  %v299_v14 = vld [vmem:[%s3902_s1 + $0x158] sm:$0xff]  ;;  %v298_v17 = vld [vmem:[%s3902_s1 + $0x150] sm:$0xff] }
   0x6   :  { %2305 = vmatpush3.msra.mxu0 %v270_v6  ;;  %439 = vmatprep.subr.mxu1 %v3917_v0  ;;  %v268_v12 = vld [vmem:[%s3902_s1 + $0x60] sm:$0xff]  ;;  %v267_v15 = vld [vmem:[%s3902_s1 + $0x58] sm:$0xff]  ;;  %v266_v18 = vld [vmem:[%s3902_s1 + $0x50] sm:$0xff] }
   0x7   :  { %2306 = vmatprep.subr.mxu0 %v285_v7  ;;  %440 = vmatpush1.msra.mxu1 %v301_v8  ;;  %v281_v19 = vld [vmem:[%s3902_s1 + $0xc8] sm:$0xff]  ;;  %v280_v22 = vld [vmem:[%s3902_s1 + $0xc0] sm:$0xff]  ;;  %v279_v25 = vld [vmem:[%s3902_s1 + $0xb8] sm:$0xff] }
   0x8   :  { %2307 = vmatpush3.msra.mxu0 %v269_v9  ;;  %441 = vmatprep.subr.mxu1 %v3917_v0  ;;  %v297_v20 = vld [vmem:[%s3902_s1 + $0x148] sm:$0xff]  ;;  %v296_v23 = vld [vmem:[%s3902_s1 + $0x140] sm:$0xff]  ;;  %v295_v26 = vld [vmem:[%s3902_s1 + $0x138] sm:$0xff] }
   0x9   :  { %2308 = vmatprep.subr.mxu0 %v284_v10  ;;  %442 = vmatpush1.msra.mxu1 %v300_v11  ;;  %v265_v21 = vld [vmem:[%s3902_s1 + $0x48] sm:$0xff]  ;;  %v264_v24 = vld [vmem:[%s3902_s1 + $0x40] sm:$0xff]  ;;  %v263_v27 = vld [vmem:[%s3902_s1 + $0x38] sm:$0xff] }
   0xa   :  { %2309 = vmatpush3.msra.mxu0 %v268_v12  ;;  %443 = vmatprep.subr.mxu1 %v3917_v0  ;;  %v278_v28 = vld [vmem:[%s3902_s1 + $0xb0] sm:$0xff]  ;;  %v277_v31 = vld [vmem:[%s3902_s1 + $0xa8] sm:$0xff]  ;;  %v276_v34 = vld [vmem:[%s3902_s1 + $0xa0] sm:$0xff] }
   0xb   :  { %2310 = vmatprep.subr.mxu0 %v283_v13  ;;  %444 = vmatpush1.msra.mxu1 %v299_v14  ;;  %v294_v29 = vld [vmem:[%s3902_s1 + $0x130] sm:$0xff]  ;;  %v293_v32 = vld [vmem:[%s3902_s1 + $0x128] sm:$0xff]  ;;  %v292_v35 = vld [vmem:[%s3902_s1 + $0x120] sm:$0xff] }
   0xc   :  { %2311 = vmatpush3.msra.mxu0 %v267_v15  ;;  %445 = vmatprep.subr.mxu1 %v3917_v0  ;;  %v262_v30 = vld [vmem:[%s3902_s1 + $0x30] sm:$0xff]  ;;  %v261_v33 = vld [vmem:[%s3902_s1 + $0x28] sm:$0xff]  ;;  %v260_v36 = vld [vmem:[%s3902_s1 + $0x20] sm:$0xff] }
   0xd   :  { %2312 = vmatprep.subr.mxu0 %v282_v16  ;;  %446 = vmatpush1.msra.mxu1 %v298_v17  ;;  %v275_v37 = vld [vmem:[%s3902_s1 + $0x98] sm:$0xff]  ;;  %v274_v40 = vld [vmem:[%s3902_s1 + $0x90] sm:$0xff]  ;;  %v2794_v41 = vld [vmem:[%s3903_s0 + $0x48] sm:$0xff] }
   0xe   :  { %2313 = vmatpush3.msra.mxu0 %v266_v18  ;;  %447 = vmatprep.subr.mxu1 %v3917_v0  ;;  %v291_v38 = vld [vmem:[%s3902_s1 + $0x118] sm:$0xff]  ;;  %v2799_v42 = vld [vmem:[%s3903_s0 + $0x40] sm:$0xff]  ;;  %v290_v43 = vld [vmem:[%s3902_s1 + $0x110] sm:$0xff]  ;;  %v137_v8 = vmul.f32 %v2794_v41, %v2794_v41 }
   0xf   :  { %2314 = vmatprep.subr.mxu0 %v281_v19  ;;  %448 = vmatpush1.msra.mxu1 %v297_v20  ;;  %v259_v39 = vld [vmem:[%s3902_s1 + $0x18] sm:$0xff]  ;;  %v48_v44 = vld [vmem:[%s3903_s0 + $0x8] sm:$0xff]  ;;  %v47_v45 = vld [vmem:[%s3903_s0] sm:$0xff]  ;;  %v92_v46 = vadd.f32 %v2794_v41, %v2799_v42  ;;  %v136_v12 = vmul.f32 %v2799_v42, %v2799_v42 }
  0x10   :  { %2315 = vmatpush3.msra.mxu0 %v265_v21  ;;  %449 = vmatprep.subr.mxu1 %v3917_v0  ;;  %v258_v47 = vld [vmem:[%s3902_s1 + $0x10] sm:$0xff]  ;;  %v273_v48 = vld [vmem:[%s3902_s1 + $0x88] sm:$0xff]  ;;  %v129_v50 = vmul.f32 %v48_v44, %v48_v44  ;;  %v128_v51 = vmul.f32 %v47_v45, %v47_v45  ;;  %v272_v53 = vld [vmem:[%s3902_s1 + $0x80] sm:$0xff]  ;;  %v79_v59 = vadd.f32 %v48_v44, %v47_v45 }
  0x11   :  { %2316 = vmatprep.subr.mxu0 %v280_v22  ;;  %450 = vmatpush1.msra.mxu1 %v296_v23  ;;  %v289_v49 = vld [vmem:[%s3902_s1 + $0x108] sm:$0xff]  ;;  %v49_v56 = vld [vmem:[%s3903_s0 + $0x10] sm:$0xff]  ;;  %v51_v57 = vld [vmem:[%s3903_s0 + $0x20] sm:$0xff] }
  0x12   :  { %2317 = vmatpush3.msra.mxu0 %v264_v24  ;;  %451 = vmatprep.subr.mxu1 %v3917_v0  ;;  %v257_v52 = vld [vmem:[%s3902_s1 + $0x8] sm:$0xff]  ;;  %v2841_v58 = vld [vmem:[%s3903_s0 + $0x50] sm:$0xff]  ;;  %v288_v60 = vld [vmem:[%s3902_s1 + $0x100] sm:$0xff]  ;;  %v130_v62 = vmul.f32 %v49_v56, %v49_v56  ;;  %v132_v63 = vmul.f32 %v51_v57, %v51_v57  ;;  %v160_v6 = vadd.f32 %v129_v50, %v128_v51 }
  0x13   :  { %2318 = vmatprep.subr.mxu0 %v279_v25  ;;  %452 = vmatpush1.msra.mxu1 %v295_v26  ;;  %v52_v54 = vld [vmem:[%s3903_s0 + $0x28] sm:$0xff]  ;;  %v50_v61 = vld [vmem:[%s3903_s0 + $0x18] sm:$0xff]  ;;  %v93_v2 = vadd.f32 %v92_v46, %v2841_v58  ;;  %v256_v3 = vld [vmem:[%s3902_s1] sm:$0xff]  ;;  %v80_v13 = vadd.f32 %v79_v59, %v49_v56  ;;  %v138_v25 = vmul.f32 %v2841_v58, %v2841_v58 }
  0x14   :  { %2319 = vmatpush3.msra.mxu0 %v263_v27  ;;  %453 = vmatprep.subr.mxu1 %v3917_v0  ;;  %v133_v55 = vmul.f32 %v52_v54, %v52_v54  ;;  %v2853_v1 = vld [vmem:[%s3903_s0 + $0x58] sm:$0xff]  ;;  %v131_v4 = vmul.f32 %v50_v61, %v50_v61  ;;  %v86_v7 = vadd.f32 %v52_v54, %v51_v57  ;;  %v53_v9 = vld [vmem:[%s3903_s0 + $0x30] sm:$0xff]  ;;  %v305_v10 = vld [vmem:[%s3902_s1 + $0x188] sm:$0xff]  ;;  %v82_v16 = vsel %vm81_vm0, %v50_v61, 0.0 }
  0x15   :  { %2320 = vmatprep.subr.mxu0 %v278_v28  ;;  %454 = vmatpush1.msra.mxu1 %v294_v29  ;;  %v94_v5 = vsel %vm81_vm0, %v2853_v1, 0.0  ;;  %v134_v11 = vmul.f32 %v53_v9, %v53_v9  ;;  %v54_v14 = vld [vmem:[%s3903_s0 + $0x38] sm:$0xff]  ;;  %v161_v17 = vadd.f32 %v160_v6, %v130_v62  ;;  %v304_v19 = vld [vmem:[%s3902_s1 + $0x180] sm:$0xff]  ;;  %v60_v20 = vld [vmem:[%s3903_s0 + $0x68] sm:$0xff]  ;;  %v83_v28 = vadd.f32 %v82_v16, %v80_v13 }
  0x16   :  { %2321 = vmatpush3.msra.mxu0 %v262_v30  ;;  %455 = vmatprep.subr.mxu1 %v3917_v0  ;;  %v95_v15 = vadd.f32 %v94_v5, %v93_v2  ;;  %v166_v18 = vadd.f32 %v133_v55, %v132_v63  ;;  %v2886_v21 = vld [vmem:[%s3903_s0 + $0x60] sm:$0xff]  ;;  %v162_v22 = vsel %vm81_vm0, %v131_v4, 0.0  ;;  %v135_v23 = vmul.f32 %v54_v14, %v54_v14  ;;  %v66_v51 = vld [vmem:[%s3903_s0 + $0x98] sm:$0xff]  ;;  %v69_v5 = vld [vmem:[%s3903_s0 + $0xb0] sm:$0xff] }
  0x17   :  { %2322 = vmatprep.subr.mxu0 %v277_v31  ;;  %456 = vmatpush1.msra.mxu1 %v293_v32  ;;  %v141_v24 = vmul.f32 %v60_v20, %v60_v20  ;;  %v98_v26 = vadd.f32 %v60_v20, %v2886_v21  ;;  %v140_v27 = vmul.f32 %v2886_v21, %v2886_v21  ;;  %v88_v31 = vsel %vm81_vm0, %v54_v14, 0.0  ;;  %v70_v4 = vld [vmem:[%s3903_s0 + $0xb8] sm:$0xff] }
  0x18   :  { %2323 = vmatpush3.msra.mxu0 %v261_v33  ;;  %457 = vmatprep.subr.mxu1 %v3917_v0  ;;  %v87_v29 = vadd.f32 %v86_v7, %v53_v9  ;;  %v163_v30 = vadd.f32 %v162_v22, %v161_v17  ;;  %v167_v32 = vadd.f32 %v166_v18, %v134_v11  ;;  %v112_v11 = vsel %vm81_vm0, %v70_v4, 0.0 }
  0x19   :  { %2324 = vmatprep.subr.mxu0 %v276_v34  ;;  %458 = vmatpush1.msra.mxu1 %v292_v35  ;;  %v172_v33 = vadd.f32 %v137_v8, %v136_v12  ;;  %v62_v34 = vld [vmem:[%s3903_s0 + $0x78] sm:$0xff]  ;;  %v64_v35 = vld [vmem:[%s3903_s0 + $0x88] sm:$0xff]  ;;  %v178_v50 = vadd.f32 %v141_v24, %v140_v27  ;;  %v147_v7 = vmul.f32 %v66_v51, %v66_v51 }
  0x1a   :  { %2325 = vmatpush3.msra.mxu0 %v260_v36  ;;  %459 = vmatprep.subr.mxu1 %v3917_v0  ;;  %v168_v36 = vsel %vm81_vm0, %v135_v23, 0.0  ;;  %v89_v46 = vadd.f32 %v88_v31, %v87_v29  ;;  %v150_v8 = vmul.f32 %v69_v5, %v69_v5  ;;  %v151_v22 = vmul.f32 %v70_v4, %v70_v4 }
  0x1b   :  { %2326 = vmatprep.subr.mxu0 %v275_v37  ;;  %460 = vmatpush1.msra.mxu1 %v291_v38  ;;  %v139_v37 = vmul.f32 %v2853_v1, %v2853_v1  ;;  %v145_v38 = vmul.f32 %v64_v35, %v64_v35 }
  0x1c   :  { %2327 = vmatpush3.msra.mxu0 %v259_v39  ;;  %461 = vmatprep.subr.mxu1 %v3917_v0  ;;  %v61_v39 = vld [vmem:[%s3903_s0 + $0x70] sm:$0xff] }
  0x1d   :  { %2328 = vmatprep.subr.mxu0 %v274_v40  ;;  %462 = vmatpush1.msra.mxu1 %v290_v43  ;;  %v63_v40 = vld [vmem:[%s3903_s0 + $0x80] sm:$0xff]  ;;  %v100_v43 = vsel %vm81_vm0, %v62_v34, 0.0 }
  0x1e   :  { %2329 = vmatpush3.msra.mxu0 %v258_v47  ;;  %463 = vmatprep.subr.mxu1 %v3917_v0  ;;  %v99_v47 = vadd.f32 %v98_v26, %v61_v39  ;;  %v73_v26 = vld [vmem:[%s3903_s0 + $0xd0] sm:$0xff] }
  0x1f   :  { %2330 = vmatprep.subr.mxu0 %v273_v48  ;;  %464 = vmatpush1.msra.mxu1 %v289_v49  ;;  %v144_v48 = vmul.f32 %v63_v40, %v63_v40  ;;  %v169_v49 = vadd.f32 %v168_v36, %v167_v32  ;;  %v78_v32 = vld [vmem:[%s3903_s0 + $0xf8] sm:$0xff] }
  0x20   :  { %2331 = vmatpush3.msra.mxu0 %v257_v52  ;;  %465 = vmatprep.subr.mxu1 %v3917_v0  ;;  %v68_v52 = vld [vmem:[%s3903_s0 + $0xa8] sm:$0xff] }
  0x21   :  { %2332 = vmatprep.subr.mxu0 %v272_v53  ;;  %466 = vmatpush1.msra.mxu1 %v288_v60  ;;  %v174_v53 = vsel %vm81_vm0, %v139_v37, 0.0  ;;  %v149_v55 = vmul.f32 %v68_v52, %v68_v52  ;;  %v192_v37 = vsel %vm81_vm0, %v151_v22, 0.0 }
  0x22   :  { %2333 = vmatpush3.msra.mxu0 %v256_v3  ;;  %394 = vmatprep.mubr.f32.mxu0 %v48_v44  ;;  %v142_v44 = vmul.f32 %v61_v39, %v61_v39  ;;  %v184_v3 = vadd.f32 %v145_v38, %v144_v48  ;;  %v159_v38 = vmul.f32 %v78_v32, %v78_v32 }
  0x23   :  { %495 = vmatprep.subr.mxu1 %v3917_v0  ;;  %395 = vmatmul.mubr.f32.vlgmr.msra.gmra.mxu0 %v47_v45  ;;  %v104_v45 = vadd.f32 %v64_v35, %v63_v40 }
  0x24   :  { %496 = vmatpush2.msra.mxu1 %v305_v10  ;;  %2229 = vmatprep.mubr.msk.f32.mxu1 %vm81_vm0, %v50_v61  ;;  %v101_v61 = vadd.f32 %v100_v43, %v99_v47  ;;  %v179_v2 = vadd.f32 %v178_v50, %v142_v44  ;;  %v76_v10 = vld [vmem:[%s3903_s0 + $0xe8] sm:$0xff] }
  0x25   :  { %497 = vmatprep.subr.mxu1 %v3917_v0  ;;  %399 = vmatprep.mubr.f32.mxu0 %v52_v54  ;;  %v143_v54 = vmul.f32 %v62_v34, %v62_v34  ;;  %v157_v13 = vmul.f32 %v76_v10, %v76_v10 }
  0x26   :  { %498 = vmatpush2.msra.mxu1 %v304_v19  ;;  %96 = vadd.xlane.f32.xlu1 %v95_v15 }
  0x27   :  { %500 = vmatmul.mubr.f32.vlgmr.msra.gmra.mxu1 %v49_v56  ;;  %400 = vmatmul.mubr.f32.gmra.mxu0 %v51_v57  ;;  %v67_v56 = vld [vmem:[%s3903_s0 + $0xa0] sm:$0xff]  ;;  %v106_v57 = vsel %vm81_vm0, %v66_v51, 0.0  ;;  %v180_v6 = vsel %vm81_vm0, %v143_v54, 0.0  ;;  %v597_v54 = vld [vmem:[%s3904_s4 + $0x18] sm:$0xff] }
  0x28   :  { %2230 = vmatprep.mubr.msk.f32.mxu1 %vm81_vm0, %v54_v14  ;;  %404 = vmatprep.mubr.f32.mxu0 %v2794_v41  ;;  %v173_v41 = vadd.f32 %v172_v33, %v138_v25  ;;  %v110_v60 = vadd.f32 %v68_v52, %v67_v56  ;;  %v148_v63 = vmul.f32 %v67_v56, %v67_v56  ;;  %v75_v14 = vld [vmem:[%s3903_s0 + $0xe0] sm:$0xff]  ;;  %v74_v25 = vld [vmem:[%s3903_s0 + $0xd8] sm:$0xff] }
  0x29   :  { %84 = vadd.xlane.f32.xlu0 %v83_v28  ;;  %v156_v17 = vmul.f32 %v75_v14, %v75_v14  ;;  %v181_v18 = vadd.f32 %v180_v6, %v179_v2  ;;  %v122_v27 = vadd.f32 %v76_v10, %v75_v14  ;;  %v77_v28 = vld [vmem:[%s3903_s0 + $0xf0] sm:$0xff]  ;;  %v118_v31 = vsel %vm81_vm0, %v74_v25, 0.0  ;;  %2404 = vmatprep.subr.mxu0 %v597_v54 }
  0x2a   :  { %164 = vadd.xlane.f32.xlu1 %v163_v30  ;;  %v111_v16 = vadd.f32 %v110_v60, %v69_v5  ;;  %v158_v33 = vmul.f32 %v77_v28, %v77_v28  ;;  %v155_v47 = vmul.f32 %v74_v25, %v74_v25  ;;  %2405 = vmatpush3.msra.mxu0 %v597_v54 }
  0x2b   :  { %505 = vmatmul.mubr.f32.gmra.mxu1 %v53_v9  ;;  %405 = vmatmul.mubr.f32.gmra.mxu0 %v2799_v42  ;;  %v65_v42 = vld [vmem:[%s3903_s0 + $0x90] sm:$0xff]  ;;  %v71_v9 = vld [vmem:[%s3903_s0 + $0xc0] sm:$0xff]  ;;  %v202_v36 = vadd.f32 %v157_v13, %v156_v17  ;;  %v123_v43 = vadd.f32 %v122_v27, %v77_v28 }
  0x2c   :  { %2231 = vmatprep.mubr.msk.f32.mxu1 %vm81_vm0, %v2853_v1  ;;  %409 = vmatprep.mubr.f32.mxu0 %v60_v20  ;;  %v146_v59 = vmul.f32 %v65_v42, %v65_v42  ;;  %v105_v62 = vadd.f32 %v104_v45, %v65_v42  ;;  %v175_v1 = vadd.f32 %v174_v53, %v173_v41 }
  0x2d   :  { %90 = vadd.xlane.f32.xlu0 %v89_v46  ;;  %v190_v20 = vadd.f32 %v149_v55, %v148_v63  ;;  %v152_v24 = vmul.f32 %v71_v9, %v71_v9  ;;  %v113_v29 = vadd.f32 %v112_v11, %v111_v16  ;;  %v124_v46 = vsel %vm81_vm0, %v78_v32, 0.0  ;;  %v596_v55 = vld [vmem:[%s3904_s4 + $0x10] sm:$0xff] }
  0x2e   :  { %170 = vadd.xlane.f32.xlu1 %v169_v49  ;;  %v107_v15 = vadd.f32 %v106_v57, %v105_v62  ;;  %v185_v19 = vadd.f32 %v184_v3, %v146_v59  ;;  %v203_v48 = vadd.f32 %v202_v36, %v158_v33  ;;  %v204_v49 = vsel %vm81_vm0, %v159_v38, 0.0  ;;  %2406 = vmatprep.subr.mxu0 %v596_v55 }
  0x2f   :  { %510 = vmatmul.mubr.f32.gmra.mxu1 %v2841_v58  ;;  %410 = vmatmul.mubr.f32.gmra.mxu0 %v2886_v21  ;;  %v72_v58 = vld [vmem:[%s3903_s0 + $0xc8] sm:$0xff]  ;;  %v186_v21 = vsel %vm81_vm0, %v147_v7, 0.0  ;;  %v125_v41 = vadd.f32 %v124_v46, %v123_v43 }
  0x30   :  { %2232 = vmatprep.mubr.msk.f32.mxu1 %vm81_vm0, %v62_v34  ;;  %414 = vmatprep.mubr.f32.mxu0 %v64_v35  ;;  %v116_v12 = vadd.f32 %v72_v58, %v71_v9  ;;  %v153_v23 = vmul.f32 %v72_v58, %v72_v58  ;;  %v187_v34 = vadd.f32 %v186_v21, %v185_v19 }
  0x31   :  { %102 = vadd.xlane.f32.xlu0 %v101_v61  ;;  %v191_v35 = vadd.f32 %v190_v20, %v150_v8  ;;  %2407 = vmatpush3.msra.mxu0 %v596_v55  ;;  %v3019_v55 = vld [vmem:[%s3906_s3] ss:$0 sm:$0xff] }
  0x32   :  { %176 = vadd.xlane.f32.xlu1 %v175_v1  ;;  %v117_v30 = vadd.f32 %v116_v12, %v73_v26  ;;  %v196_v44 = vadd.f32 %v153_v23, %v152_v24 }
  0x33   :  { %515 = vmatmul.mubr.f32.gmra.mxu1 %v61_v39  ;;  %415 = vmatmul.mubr.f32.gmra.mxu0 %v63_v40  ;;  %v154_v39 = vmul.f32 %v73_v26, %v73_v26  ;;  %v193_v45 = vadd.f32 %v192_v37, %v191_v35 }
  0x34   :  { %2233 = vmatprep.mubr.msk.f32.mxu1 %vm81_vm0, %v66_v51  ;;  %419 = vmatprep.mubr.f32.mxu0 %v68_v52  ;;  %v119_v40 = vadd.f32 %v118_v31, %v117_v30  ;;  %v198_v51 = vsel %vm81_vm0, %v155_v47, 0.0  ;;  %v205_v52 = vadd.f32 %v204_v49, %v203_v48 }
  0x35   :  { %108 = vadd.xlane.f32.xlu0 %v107_v15  ;;  %v197_v50 = vadd.f32 %v196_v44, %v154_v39 }
  0x36   :  { %182 = vadd.xlane.f32.xlu1 %v181_v18 }
  0x37   :  { %520 = vmatmul.mubr.f32.gmra.mxu1 %v65_v42  ;;  %420 = vmatmul.mubr.f32.gmra.mxu0 %v67_v56  ;;  %v199_v53 = vadd.f32 %v198_v51, %v197_v50  ;;  %v595_v42 = vld [vmem:[%s3904_s4 + $0x8] sm:$0xff]  ;;  %v594_v56 = vld [vmem:[%s3904_s4] sm:$0xff] }
  0x38   :  { %2234 = vmatprep.mubr.msk.f32.mxu1 %vm81_vm0, %v70_v4  ;;  %424 = vmatprep.mubr.f32.mxu0 %v72_v58 }
  0x39   :  { %114 = vadd.xlane.f32.xlu0 %v113_v29  ;;  %2408 = vmatprep.subr.mxu0 %v595_v42 }
  0x3a   :  { %188 = vadd.xlane.f32.xlu1 %v187_v34  ;;  %2409 = vmatpush3.msra.mxu0 %v595_v42 }
  0x3b   :  { %525 = vmatmul.mubr.f32.gmra.mxu1 %v69_v5  ;;  %425 = vmatmul.mubr.f32.gmra.mxu0 %v71_v9 }
  0x3c   :  { %2235 = vmatprep.mubr.msk.f32.mxu1 %vm81_vm0, %v74_v25  ;;  %429 = vmatprep.mubr.f32.mxu0 %v76_v10 }
  0x3d   :  { %120 = vadd.xlane.f32.xlu0 %v119_v40  ;;  %2410 = vmatprep.subr.mxu0 %v594_v56 }
  0x3e   :  { %194 = vadd.xlane.f32.xlu1 %v193_v45  ;;  %2411 = vmatpush3.msra.mxu0 %v594_v56 }
  0x3f   :  { %530 = vmatmul.mubr.f32.gmra.mxu1 %v73_v26  ;;  %430 = vmatmul.mubr.f32.gmra.mxu0 %v75_v14 }
  0x40   :  { %2236 = vmatprep.mubr.msk.f32.mxu1 %vm81_vm0, %v78_v32  ;;  %v3009_v32 = vld [vmem:[%s3905_s2] ss:$0 sm:$0xff] }
  0x41   :  { %126 = vadd.xlane.f32.xlu0 %v125_v41 }
  0x42   :  { %206 = vadd.xlane.f32.xlu1 %v205_v52 }
  0x43   :  { %535 = vmatmul.mubr.f32.gmra.mxu1 %v77_v28 }
  0x45   :  { %200 = vadd.xlane.f32.xlu0 %v199_v53 }
  0xaf   :  { %v97_v59 = vpop.xlane.xlu1 %96 }
  0xb0   :  { %v2992_v7 = vmul.f32 0.0025, %v97_v59 }
  0xb2   :  { %v85_v57 = vpop.xlane.xlu0 %84  ;;  %v218_v11 = vmul.f32 %v2992_v7, %v97_v59 }
  0xb3   :  { %v165_v61 = vpop.xlane.xlu1 %164  ;;  %v208_v62 = vmul.f32 0.0025, %v85_v57 }
  0xb5   :  { %v216_v1 = vmul.f32 %v208_v62, %v85_v57  ;;  %v547_v44 = vmul.f32 %v3009_v32, %v208_v62 }
  0xb6   :  { %v91_v60 = vpop.xlane.xlu0 %90 }
  0xb7   :  { %v2989_v2 = vmul.f32 0.0025, %v91_v60  ;;  %v171_v3 = vpop.xlane.xlu1 %170  ;;  %v224_v5 = vsub.f32 %v165_v61, %v216_v1 }
  0xb9   :  { %v217_v6 = vmul.f32 %v2989_v2, %v91_v60  ;;  %v232_v8 = vmax.f32 %v224_v5, 1e-24  ;;  %v548_v57 = vmul.f32 %v3009_v32, %v2989_v2 }
  0xba   :  { %v103_v63 = vpop.xlane.xlu0 %102 }
  0xbb   :  { %v177_v58 = vpop.xlane.xlu1 %176  ;;  %v225_v9 = vsub.f32 %v171_v3, %v217_v6  ;;  %v2995_v12 = vmul.f32 0.0025, %v103_v63  ;;  %2527 = vrsqrt.f32 %v232_v8 }
  0xbc   :  { %v226_v16 = vsub.f32 %v177_v58, %v218_v11 }
  0xbd   :  { %v233_v14 = vmax.f32 %v225_v9, 1e-24  ;;  %v219_v15 = vmul.f32 %v2995_v12, %v103_v63 }
  0xbe   :  { %v109_v4 = vpop.xlane.xlu0 %108  ;;  %v234_v20 = vmax.f32 %v226_v16, 1e-24 }
  0xbf   :  { %v183_v13 = vpop.xlane.xlu1 %182  ;;  %v2998_v17 = vmul.f32 0.0025, %v109_v4  ;;  %2529 = vrsqrt.f32 %v233_v14 }
  0xc0   :  { %v227_v21 = vsub.f32 %v183_v13, %v219_v15  ;;  %2531 = vrsqrt.f32 %v234_v20 }
  0xc1   :  { %v220_v23 = vmul.f32 %v2998_v17, %v109_v4 }
  0xc2   :  { %v115_v10 = vpop.xlane.xlu0 %114  ;;  %v235_v25 = vmax.f32 %v227_v21, 1e-24 }
  0xc3   :  { %v189_v19 = vpop.xlane.xlu1 %188  ;;  %v3000_v22 = vmul.f32 0.0025, %v115_v10 }
  0xc4   :  { %v228_v27 = vsub.f32 %v189_v19, %v220_v23  ;;  %2533 = vrsqrt.f32 %v235_v25 }
  0xc5   :  { %v221_v26 = vmul.f32 %v3000_v22, %v115_v10  ;;  %v549_v10 = vmul.f32 %v3009_v32, %v2992_v7  ;;  %v550_v7 = vmul.f32 %v3009_v32, %v2995_v12 }
  0xc6   :  { %v121_v18 = vpop.xlane.xlu0 %120  ;;  %v236_v36 = vmax.f32 %v228_v27, 1e-24 }
  0xc7   :  { %v3004_v28 = vmul.f32 0.0025, %v121_v18  ;;  %v195_v29 = vpop.xlane.xlu1 %194 }
  0xc8   :  { %v2528_v31 = vpop.eup %2527  ;;  %v229_v34 = vsub.f32 %v195_v29, %v221_v26  ;;  %2535 = vrsqrt.f32 %v236_v36 }
  0xc9   :  { %v222_v37 = vmul.f32 %v3004_v28, %v121_v18  ;;  %v248_v45 = vmul.f32 20.0, %v2528_v31 }
  0xca   :  { %v127_v24 = vpop.xlane.xlu0 %126  ;;  %v237_v49 = vmax.f32 %v229_v34, 1e-24 }
  0xcb   :  { %v3011_v35 = vmul.f32 0.0025, %v127_v24  ;;  %v207_v54 = vpop.xlane.xlu1 %206 }
  0xcc   :  { %v2530_v47 = vpop.eup %2529  ;;  %2537 = vrsqrt.f32 %v237_v49 }
  0xcd   :  { %v223_v41 = vmul.f32 %v3011_v35, %v127_v24  ;;  %v249_v59 = vmul.f32 20.0, %v2530_v47  ;;  %v2532_v3 = vpop.eup %2531 }
  0xce   :  { %v201_v39 = vpop.xlane.xlu0 %200  ;;  %v250_v14 = vmul.f32 20.0, %v2532_v3 }
  0xcf   :  { %v230_v53 = vsub.f32 %v201_v39, %v222_v37  ;;  %v231_v1 = vsub.f32 %v207_v54, %v223_v41  ;;  %v552_v54 = vmul.f32 %v3009_v32, %v3000_v22 }
  0xd1   :  { %v238_v6 = vmax.f32 %v230_v53, 1e-24  ;;  %v239_v16 = vmax.f32 %v231_v1, 1e-24  ;;  %v2534_v19 = vpop.eup %2533 }
  0xd3   :  { %2539 = vrsqrt.f32 %v238_v6 }
  0xd4   :  { %2541 = vrsqrt.f32 %v239_v16  ;;  %v554_v16 = vmul.f32 %v3009_v32, %v3011_v35 }
  0xe3   :  { %v2334_v30 = vpop.f32.mrf.mxu0 }
  0xe5   :  { %v2335_v33 = vpop.f32.mrf.mxu0 }
  0xe6   :  { %v2336_v38 = vadd.f32 %v2335_v33, %v2334_v30  ;;  %v251_v30 = vmul.f32 20.0, %v2534_v19 }
  0xe7   :  { %v501_v40 = vpop.f32.mrf.mxu1  ;;  %v2337_v43 = vpop.f32.mrf.mxu0 }
  0xe8   :  { %v502_v46 = vadd.f32 %v2336_v38, %v501_v40  ;;  %v2536_v38 = vpop.eup %2535 }
  0xe9   :  { %v503_v48 = vpop.f32.mrf.mxu1  ;;  %v2338_v50 = vpop.f32.mrf.mxu0  ;;  %v252_v49 = vmul.f32 20.0, %v2536_v38 }
  0xea   :  { %v555_v51 = vsub.f32 %v502_v46, %v547_v44  ;;  %v2339_v52 = vadd.f32 %v2338_v50, %v2337_v43  ;;  %v551_v43 = vmul.f32 %v3009_v32, %v2998_v17  ;;  %v2538_v48 = vpop.eup %2537 }
  0xeb   :  { %v506_v42 = vpop.f32.mrf.mxu1  ;;  %v2340_v56 = vpop.f32.mrf.mxu0 }
  0xec   :  { %v563_v60 = vmul.f32 %v555_v51, %v248_v45  ;;  %v507_v61 = vadd.f32 %v2339_v52, %v506_v42  ;;  %v2540_v1 = vpop.eup %2539 }
  0xed   :  { %v508_v62 = vpop.f32.mrf.mxu1  ;;  %v2341_v63 = vpop.f32.mrf.mxu0 }
  0xee   :  { %v578_v4 = vadd.f32 %v3019_v55, %v563_v60  ;;  %v556_v5 = vsub.f32 %v507_v61, %v548_v57  ;;  %v2342_v58 = vadd.f32 %v2341_v63, %v2340_v56  ;;  %v253_v60 = vmul.f32 20.0, %v2538_v48 }
  0xef   :  { %v511_v8 = vpop.f32.mrf.mxu1  ;;  %v2343_v9 = vpop.f32.mrf.mxu0 }
  0xf0   :  { %v586_v2 = vmax.f32 %v578_v4, 0.0  ;;  %v564_v11 = vmul.f32 %v556_v5, %v249_v59  ;;  %v512_v13 = vadd.f32 %v2342_v58, %v511_v8  ;;  %v553_v5 = vmul.f32 %v3009_v32, %v3004_v28  ;;  %v3054_v32 = vld [vmem:[%s3907_s5] ss:$0 sm:$0xff] }
  0xf1   :  { %v513_v15 = vpop.f32.mrf.mxu1  ;;  %v2344_v18 = vpop.f32.mrf.mxu0 }
  0xf2   :  { %v579_v20 = vadd.f32 %v3019_v55, %v564_v11  ;;  %v557_v21 = vsub.f32 %v512_v13, %v549_v10  ;;  %v2345_v23 = vadd.f32 %v2344_v18, %v2343_v9  ;;  %2412 = vmatprep.mubr.msk.f32.mxu0 %vm605_vm1, %v586_v2  ;;  %v254_v10 = vmul.f32 20.0, %v2540_v1 }
  0xf3   :  { %v516_v24 = vpop.f32.mrf.mxu1  ;;  %v2346_v25 = vpop.f32.mrf.mxu0 }
  0xf4   :  { %v587_v26 = vmax.f32 %v579_v20, 0.0  ;;  %v565_v27 = vmul.f32 %v557_v21, %v250_v14  ;;  %v517_v29 = vadd.f32 %v2345_v23, %v516_v24  ;;  %v2542_v14 = vpop.eup %2541 }
  0xf5   :  { %v518_v31 = vpop.f32.mrf.mxu1  ;;  %v2347_v33 = vpop.f32.mrf.mxu0  ;;  %v255_v21 = vmul.f32 20.0, %v2542_v14 }
  0xf6   :  { %v580_v34 = vadd.f32 %v3019_v55, %v565_v27  ;;  %v558_v36 = vsub.f32 %v517_v29, %v550_v7  ;;  %v2348_v37 = vadd.f32 %v2347_v33, %v2346_v25  ;;  %2413 = vmatmul.mubr.msk.f32.vlgmr.msra.gmra.mxu0 %vm605_vm1, %v587_v26 }
  0xf7   :  { %v521_v39 = vpop.f32.mrf.mxu1  ;;  %v2349_v40 = vpop.f32.mrf.mxu0 }
  0xf8   :  { %v588_v12 = vmax.f32 %v580_v34, 0.0  ;;  %v566_v44 = vmul.f32 %v558_v36, %v251_v30  ;;  %v522_v45 = vadd.f32 %v2348_v37, %v521_v39 }
  0xf9   :  { %v523_v46 = vpop.f32.mrf.mxu1  ;;  %v2350_v47 = vpop.f32.mrf.mxu0 }
  0xfa   :  { %v581_v41 = vadd.f32 %v3019_v55, %v566_v44  ;;  %v559_v50 = vsub.f32 %v522_v45, %v551_v43  ;;  %v2351_v51 = vadd.f32 %v2350_v47, %v2349_v40  ;;  %2415 = vmatprep.mubr.msk.f32.mxu0 %vm605_vm1, %v588_v12 }
  0xfb   :  { %v526_v52 = vpop.f32.mrf.mxu1  ;;  %v2352_v53 = vpop.f32.mrf.mxu0 }
  0xfc   :  { %v589_v42 = vmax.f32 %v581_v41, 0.0  ;;  %v567_v17 = vmul.f32 %v559_v50, %v252_v49  ;;  %v527_v56 = vadd.f32 %v2351_v51, %v526_v52 }
  0xfd   :  { %v528_v57 = vpop.f32.mrf.mxu1  ;;  %v2353_v59 = vpop.f32.mrf.mxu0 }
  0xfe   :  { %v582_v61 = vadd.f32 %v3019_v55, %v567_v17  ;;  %v560_v62 = vsub.f32 %v527_v56, %v552_v54  ;;  %v2354_v63 = vadd.f32 %v2353_v59, %v2352_v53  ;;  %2416 = vmatmul.mubr.msk.f32.gmra.mxu0 %vm605_vm1, %v589_v42  ;;  %v2576_v59 = vmov 683565275  }
  0xff   :  { %v531_v3 = vpop.f32.mrf.mxu1  ;;  %v2355_v4 = vpop.f32.mrf.mxu0 }
 0x100   :  { %v590_v6 = vmax.f32 %v582_v61, 0.0  ;;  %v568_v22 = vmul.f32 %v560_v62, %v253_v60  ;;  %v532_v58 = vadd.f32 %v2354_v63, %v531_v3  ;;  %v2577_v61 = vmov 2475754826  }
 0x101   :  { %v533_v8 = vpop.f32.mrf.mxu1  ;;  %v2356_v9 = vpop.f32.mrf.mxu0  ;;  %v2578_v63 = vmov 2131351028   ;;  %v2579_v3 = vmov 2102212464  }
 0x102   :  { %v583_v2 = vadd.f32 %v3019_v55, %v568_v22  ;;  %v561_v11 = vsub.f32 %v532_v58, %v553_v5  ;;  %v2357_v13 = vadd.f32 %v2356_v9, %v2355_v4  ;;  %2418 = vmatprep.mubr.msk.f32.mxu0 %vm605_vm1, %v590_v6  ;;  %v2580_v5 = vmov 920167782  }
 0x103   :  { %v536_v15 = vpop.f32.mrf.mxu1 }
 0x104   :  { %v591_v18 = vmax.f32 %v583_v2, 0.0  ;;  %v569_v19 = vmul.f32 %v561_v11, %v254_v10  ;;  %v537_v28 = vadd.f32 %v2357_v13, %v536_v15  ;;  %v2581_v2 = vmov 1326507024  }
 0x105   :  { %v538_v20 = vpop.f32.mrf.mxu1 }
 0x106   :  { %v584_v23 = vadd.f32 %v3019_v55, %v569_v19  ;;  %v562_v24 = vsub.f32 %v537_v28, %v554_v16  ;;  %2419 = vmatmul.mubr.msk.f32.gmra.mxu0 %vm605_vm1, %v591_v18 }
 0x108   :  { %v592_v25 = vmax.f32 %v584_v23, 0.0  ;;  %v570_v7 = vmul.f32 %v562_v24, %v255_v21 }
 0x10a   :  { %v585_v26 = vadd.f32 %v3019_v55, %v570_v7  ;;  %2421 = vmatprep.mubr.msk.f32.mxu0 %vm605_vm1, %v592_v25 }
 0x10c   :  { %v593_v27 = vmax.f32 %v585_v26, 0.0 }
 0x10e   :  { %2422 = vmatmul.mubr.msk.f32.gmra.mxu0 %vm605_vm1, %v593_v27 }
 0x1b6   :  { %v2414_v35 = vpop.f32.mrf.mxu0 }
 0x1b7   :  { %v3057_v29 = vadd.f32 %v2414_v35, %v3054_v32 }
 0x1b8   :  { %v696_v30 = vpop.f32.mrf.mxu0 }
 0x1b9   :  { %v839_v31 = vand.u32 2147483647, %v3057_v29  ;;  %v842_v33 = vand.u32 2139095040, %v3057_v29  ;;  %v3062_v55 = vadd.f32 %v3054_v32, %v696_v30  ;;  %vm841_vm0 = vcmp.lt.s32.totalorder %v3057_v29, 0 }
 0x1bb   :  { %v843_v34 = vshrl.u32 %v842_v33, 23  ;;  %v846_v36 = vand.u32 8388607, %v839_v31  ;;  %v735_v37 = vand.u32 2147483647, %v3062_v55  ;;  %v738_v38 = vand.u32 2139095040, %v3062_v55 }
 0x1bd   :  { %v2252_v39 = vadd.s32 4294967169, %v843_v34  ;;  %v739_v40 = vshrl.u32 %v738_v38, 23  ;;  %v742_v43 = vand.u32 8388607, %v735_v37  ;;  %v847_v44 = vor.u32 8388608, %v846_v36 }
 0x1be   :  { %v2417_v12 = vpop.f32.mrf.mxu0 }
 0x1bf   :  { %v849_v45 = vadd.s32 1, %v2252_v39  ;;  %v2248_v46 = vadd.s32 4294967169, %v739_v40  ;;  %v743_v47 = vor.u32 8388608, %v742_v43  ;;  %v3071_v48 = vadd.f32 %v2417_v12, %v3054_v32 }
 0x1c0   :  { %v706_v49 = vpop.f32.mrf.mxu0  ;;  %v3073_v53 = vshll.u32 %v847_v44, 8 }
 0x1c1   :  { %vm850_vm2 = vcmp.gt.s32.totalorder %v849_v45, 0  ;;  %v745_v50 = vadd.s32 1, %v2248_v46  ;;  %v3075_v54 = vshll.u32 %v743_v47, 8  ;;  %v1047_v42 = vand.u32 2147483647, %v3071_v48 }
 0x1c2   :  { %v851_v41 = vsel %vm850_vm2, %v849_v45, 0  ;;  %v1050_v17 = vand.u32 2139095040, %v3071_v48  ;;  %v3080_v56 = vadd.f32 %v3054_v32, %v706_v49 }
 0x1c3   :  { %v852_v51 = vshrl.u32 %v851_v41, 5  ;;  %v853_v52 = vand.u32 31, %v851_v41  ;;  %vm746_vm3 = vcmp.gt.s32.totalorder %v745_v50, 0 }
 0x1c4   :  { %v747_v16 = vsel %vm746_vm3, %v745_v50, 0  ;;  %v1051_v34 = vshrl.u32 %v1050_v17, 23 }
 0x1c5   :  { %v854_v57 = vsub.s32 32, %v853_v52  ;;  %v856_v60 = vshll.u32 %v2576_v59, %v853_v52  ;;  %v859_v62 = vshll.u32 %v2577_v61, %v853_v52  ;;  %v862_v1 = vshll.u32 %v2578_v63, %v853_v52 }
 0x1c6   :  { %v865_v4 = vshll.u32 %v2579_v3, %v853_v52  ;;  %v868_v6 = vshll.u32 %v2580_v5, %v853_v52  ;;  %vm871_vm4 = vcmp.lt.s32.totalorder %v852_v51, 1  ;;  %vm872_vm5 = vcmp.lt.s32.totalorder %v852_v51, 2 }
 0x1c7   :  { %v857_v22 = vshrl.u32 %v2577_v61, %v854_v57  ;;  %v860_v58 = vshrl.u32 %v2578_v63, %v854_v57  ;;  %v863_v8 = vshrl.u32 %v2579_v3, %v854_v57  ;;  %v855_v9 = vshrl.u32 %v2576_v59, %v854_v57 }
 0x1c8   :  { %v866_v10 = vshrl.u32 %v2580_v5, %v854_v57  ;;  %v869_v11 = vshrl.u32 %v2581_v2, %v854_v57  ;;  %vm873_vm6 = vcmp.lt.s32.totalorder %v852_v51, 3  ;;  %vm874_vm7 = vcmp.lt.s32.totalorder %v852_v51, 4 }
 0x1c9   :  { %v858_v13 = vor.u32 %v857_v22, %v856_v60  ;;  %v861_v14 = vor.u32 %v860_v58, %v859_v62  ;;  %v864_v15 = vor.u32 %v863_v8, %v862_v1  ;;  %v749_v28 = vand.u32 31, %v747_v16 }
 0x1ca   :  { %v867_v18 = vor.u32 %v866_v10, %v865_v4  ;;  %v870_v19 = vor.u32 %v869_v11, %v868_v6  ;;  %v748_v39 = vshrl.u32 %v747_v16, 5 }
 0x1cb   :  { %v875_v20 = vsel %vm871_vm4, %v855_v9, %v858_v13  ;;  %v876_v21 = vsel %vm874_vm7, %v864_v15, 2102212464  ;;  %v879_v23 = vsel %vm871_vm4, %v858_v13, %v861_v14  ;;  %v883_v24 = vsel %vm871_vm4, %v861_v14, %v864_v15 }
 0x1cc   :  { %v877_v25 = vsel %vm873_vm6, %v861_v14, %v876_v21  ;;  %v880_v7 = vsel %vm874_vm7, %v867_v18, 920167782  ;;  %v884_v26 = vsel %vm874_vm7, %v870_v19, 1326507024  ;;  %v750_v27 = vsub.s32 32, %v749_v28 }
 0x1cd   :  { %v878_v35 = vsel %vm872_vm5, %v875_v20, %v877_v25  ;;  %v881_v30 = vsel %vm873_vm6, %v864_v15, %v880_v7  ;;  %v885_v33 = vsel %vm873_vm6, %v867_v18, %v884_v26  ;;  %v752_v40 = vshll.u32 %v2576_v59, %v749_v28 }
 0x1ce   :  { %v882_v36 = vsel %vm872_vm5, %v879_v23, %v881_v30  ;;  %v886_v38 = vsel %vm872_vm5, %v883_v24, %v885_v33  ;;  %v894_v46 = vmul.u32 %v3073_v53, %v878_v35  ;;  %v753_v47 = vshrl.u32 %v2577_v61, %v750_v27 }
 0x1cf   :  { %v3105_v43 = vmul.u32.u64.low %v3073_v53, %v886_v38  ;;  %v3106_v12 = vmul.u32.u64.high %v3073_v53, %v886_v38, %v3105_v43  ;;  %v3109_v44 = vmul.u32.u64.low %v3073_v53, %v882_v36  ;;  %v3110_v45 = vmul.u32.u64.high %v3073_v53, %v882_v36, %v3109_v44 }
 0x1d0   :  { %v755_v49 = vshll.u32 %v2577_v61, %v749_v28  ;;  %v756_v41 = vshrl.u32 %v2578_v63, %v750_v27  ;;  %v758_v50 = vshll.u32 %v2578_v63, %v749_v28  ;;  %v759_v51 = vshrl.u32 %v2579_v3, %v750_v27 }
 0x1d1   :  { %v761_v52 = vshll.u32 %v2579_v3, %v749_v28  ;;  %v762_v17 = vshrl.u32 %v2580_v5, %v750_v27  ;;  %v754_v57 = vor.u32 %v753_v47, %v752_v40  ;;  %v764_v62 = vshll.u32 %v2580_v5, %v749_v28 }
 0x1d2   :  { %v757_v60 = vor.u32 %v756_v41, %v755_v49  ;;  %v765_v53 = vshrl.u32 %v2581_v2, %v750_v27  ;;  %vm896_vm8 = vc.u32 %v3106_v12, %v3109_v44  ;;  %v897_v1 = vadd.s32 1, %v3110_v45 }
 0x1d3   :  { %v751_v4 = vshrl.u32 %v2576_v59, %v750_v27  ;;  %v760_v6 = vor.u32 %v759_v51, %v758_v50  ;;  %v763_v22 = vor.u32 %v762_v17, %v761_v52  ;;  %vm767_vm9 = vcmp.lt.s32.totalorder %v748_v39, 1 }
 0x1d4   :  { %v766_v58 = vor.u32 %v765_v53, %v764_v62  ;;  %vm768_vm10 = vcmp.lt.s32.totalorder %v748_v39, 2  ;;  %v898_v8 = vsel %vm896_vm8, %v897_v1, %v3110_v45  ;;  %vm769_vm11 = vcmp.lt.s32.totalorder %v748_v39, 3 }
 0x1d5   :  { %vm770_vm12 = vcmp.lt.s32.totalorder %v748_v39, 4  ;;  %v775_v9 = vsel %vm767_vm9, %v754_v57, %v757_v60  ;;  %v899_v10 = vadd.s32 %v898_v8, %v894_v46  ;;  %v779_v14 = vsel %vm767_vm9, %v757_v60, %v760_v6 }
 0x1d6   :  { %v772_v11 = vsel %vm770_vm12, %v760_v6, 2102212464  ;;  %v776_v13 = vsel %vm770_vm12, %v763_v22, 920167782  ;;  %v771_v15 = vsel %vm767_vm9, %v751_v4, %v754_v57  ;;  %v780_v18 = vsel %vm770_vm12, %v766_v58, 1326507024 }
 0x1d7   :  { %v777_v16 = vsel %vm769_vm11, %v760_v6, %v776_v13  ;;  %v2260_v19 = vadd.s32 4294967169, %v1051_v34  ;;  %v900_v28 = vadd.s32 536870912, %v899_v10  ;;  %v773_v20 = vsel %vm769_vm11, %v757_v60, %v772_v11 }
 0x1d8   :  { %v778_v21 = vsel %vm768_vm10, %v775_v9, %v777_v16  ;;  %v781_v23 = vsel %vm769_vm11, %v763_v22, %v780_v18  ;;  %v1054_v30 = vand.u32 8388607, %v1047_v42  ;;  %v774_v33 = vsel %vm768_vm10, %v771_v15, %v773_v20 }
 0x1d9   :  { %v782_v24 = vsel %vm768_vm10, %v779_v14, %v781_v23  ;;  %v3131_v25 = vmul.u32.u64.low %v3075_v54, %v778_v21  ;;  %v3132_v7 = vmul.u32.u64.high %v3075_v54, %v778_v21, %v3131_v25  ;;  %v3135_v26 = vshrl.u32 %v900_v28, 30 }
 0x1da   :  { %v3138_v27 = vmul.u32.u64.low %v3075_v54, %v782_v24  ;;  %v3139_v35 = vmul.u32.u64.high %v3075_v54, %v782_v24, %v3138_v27  ;;  %v1057_v34 = vadd.s32 1, %v2260_v19  ;;  %v946_v36 = vand.u32 2139095040, %v3080_v56 }
 0x1db   :  { %v902_v38 = vshll.u32 %v3135_v26, 30  ;;  %v793_v40 = vadd.s32 1, %v3132_v7  ;;  %v943_v43 = vand.u32 2147483647, %v3080_v56  ;;  %v790_v47 = vmul.u32 %v3075_v54, %v774_v33 }
 0x1dc   :  { %vm1058_vm13 = vcmp.gt.s32.totalorder %v1057_v34, 0  ;;  %v947_v45 = vshrl.u32 %v946_v36, 23  ;;  %vm792_vm14 = vc.u32 %v3139_v35, %v3131_v25  ;;  %v1055_v39 = vor.u32 8388608, %v1054_v30 }
 0x1dd   :  { %v3148_v46 = vsub.s32 %v899_v10, %v902_v38  ;;  %v794_v49 = vsel %vm792_vm14, %v793_v40, %v3132_v7  ;;  %v1059_v41 = vsel %vm1058_vm13, %v1057_v34, 0  ;;  %v895_v57 = vadd.s32 %v3109_v44, %v3106_v12 }
 0x1de   :  { %v2256_v50 = vadd.s32 4294967169, %v947_v45  ;;  %v795_v52 = vadd.s32 %v794_v49, %v790_v47  ;;  %v3155_v17 = vshrl.u32 %v1059_v41, 5  ;;  %v925_v60 = vsub.s32 4, %v3135_v26 }
 0x1df   :  { %v905_v51 = vsub.s32 0, %v3148_v46  ;;  %v1061_v62 = vand.u32 31, %v1059_v41  ;;  %v3162_v54 = vand.u32 8388607, %v943_v43  ;;  %v3165_v4 = vshll.u32 %v1055_v39, 8 }
 0x1e0   :  { %v796_v1 = vadd.s32 536870912, %v795_v52  ;;  %v953_v6 = vadd.s32 1, %v2256_v50  ;;  %vm1079_vm15 = vcmp.lt.s32.totalorder %v3155_v17, 1  ;;  %vm1080_vm3 = vcmp.lt.s32.totalorder %v3155_v17, 2 }
 0x1e1   :  { %v2253_v53 = vmin.u32 %v905_v51, %v3148_v46  ;;  %v1062_v22 = vsub.s32 32, %v1061_v62  ;;  %v1064_v58 = vshll.u32 %v2576_v59, %v1061_v62  ;;  %v1067_v8 = vshll.u32 %v2577_v61, %v1061_v62 }
 0x1e2   :  { %v3170_v44 = vshrl.u32 %v796_v1, 30  ;;  %v1070_v9 = vshll.u32 %v2578_v63, %v1061_v62  ;;  %v1073_v10 = vshll.u32 %v2579_v3, %v1061_v62  ;;  %v1076_v15 = vshll.u32 %v2580_v5, %v1061_v62 }
 0x1e3   :  { %v907_v12 = vclz %v2253_v53  ;;  %v1065_v11 = vshrl.u32 %v2577_v61, %v1062_v22  ;;  %v1068_v13 = vshrl.u32 %v2578_v63, %v1062_v22  ;;  %v1071_v14 = vshrl.u32 %v2579_v3, %v1062_v22 }
 0x1e4   :  { %v798_v18 = vshll.u32 %v3170_v44, 30  ;;  %v1074_v19 = vshrl.u32 %v2580_v5, %v1062_v22  ;;  %v1077_v28 = vshrl.u32 %v2581_v2, %v1062_v22  ;;  %v1063_v20 = vshrl.u32 %v2576_v59, %v1062_v22  ;;  %v2420_v22 = vpop.f32.mrf.mxu0 }
 0x1e5   :  { %v2254_v16 = vadd.s32 4294967294, %v907_v12  ;;  %v1066_v21 = vor.u32 %v1065_v11, %v1064_v58  ;;  %v1069_v23 = vor.u32 %v1068_v13, %v1067_v8  ;;  %v1072_v24 = vor.u32 %v1071_v14, %v1070_v9 }
 0x1e6   :  { %v3183_v7 = vsub.s32 %v795_v52, %v798_v18  ;;  %v1075_v27 = vor.u32 %v1074_v19, %v1073_v10  ;;  %v1078_v30 = vor.u32 %v1077_v28, %v1076_v15  ;;  %vm1081_vm4 = vcmp.lt.s32.totalorder %v3155_v17, 3 }
 0x1e7   :  { %vm2255_vm2 = vcmp.lt.s32.totalorder %v2254_v16, 0  ;;  %vm1082_vm5 = vcmp.lt.s32.totalorder %v3155_v17, 4  ;;  %v1083_v40 = vsel %vm1079_vm15, %v1063_v20, %v1066_v21  ;;  %vm3193_vm6 = vcmp.le.f32.partialorder %v839_v31, 0.7853982 }
 0x1e8   :  { %v910_v33 = vsel %vm2255_vm2, 0, %v2254_v16  ;;  %v801_v38 = vsub.s32 0, %v3183_v7  ;;  %v1084_v47 = vsel %vm1082_vm5, %v1072_v24, 2102212464  ;;  %v1087_v39 = vsel %vm1079_vm15, %v1066_v21, %v1069_v23 }
 0x1e9   :  { %v911_v34 = vsub.s32 32, %v910_v33  ;;  %v915_v36 = vsub.s32 4294967266, %v910_v33  ;;  %v1088_v49 = vsel %vm1082_vm5, %v1075_v27, 920167782  ;;  %v1092_v41 = vsel %vm1082_vm5, %v1078_v30, 1326507024 }
 0x1ea   :  { %v2249_v52 = vmin.u32 %v801_v38, %v3183_v7  ;;  %v1091_v62 = vsel %vm1079_vm15, %v1069_v23, %v1072_v24  ;;  %v912_v53 = vshll.u32 %v3148_v46, %v910_v33  ;;  %v1089_v31 = vsel %vm1081_vm4, %v1072_v24, %v1088_v49 }
 0x1eb   :  { %v913_v50 = vshrl.u32 %v895_v57, %v911_v34  ;;  %v916_v51 = vadd.s32 127, %v915_v36  ;;  %v1093_v1 = vsel %vm1081_vm4, %v1075_v27, %v1092_v41  ;;  %vm954_vm7 = vcmp.gt.s32.totalorder %v953_v6, 0 }
 0x1ec   :  { %v803_v8 = vclz %v2249_v52  ;;  %v1085_v57 = vsel %vm1081_vm4, %v1069_v23, %v1084_v47  ;;  %v1090_v12 = vsel %vm1080_vm3, %v1087_v39, %v1089_v31  ;;  %v1094_v46 = vsel %vm1080_vm3, %v1091_v62, %v1093_v1 }
 0x1ed   :  { %v917_v58 = vshll.u32 %v916_v51, 23  ;;  %v914_v9 = vor.u32 %v913_v50, %v912_v53  ;;  %v3214_v10 = vmul.u32.u64.low %v3165_v4, %v1090_v12  ;;  %v3215_v11 = vmul.u32.u64.high %v3165_v4, %v1090_v12, %v3214_v10 }
 0x1ee   :  { %v2250_v14 = vadd.s32 4294967294, %v803_v8  ;;  %v955_v15 = vsel %vm954_vm7, %v953_v6, 0  ;;  %v3219_v16 = vadd.f32 %v2420_v22, %v3054_v32  ;;  %v3226_v18 = vsel %vm841_vm0, %v925_v60, %v3135_v26  ;;  %v1570_v22 = vld [vmem:[%s3908_s6 + $0x18] sm:$0xff] }
 0x1ef   :  { %v918_v13 = vor.u32 4788187, %v917_v58  ;;  %v3229_v19 = vmul.u32.u64.low %v3165_v4, %v1094_v46  ;;  %v3230_v28 = vmul.u32.u64.high %v3165_v4, %v1094_v46, %v3229_v19  ;;  %v957_v20 = vand.u32 31, %v955_v15  ;;  %2424 = vmatprep.subr.mxu1 %v1570_v22 }
 0x1f0   :  { %vm2251_vm8 = vcmp.lt.s32.totalorder %v2250_v14, 0  ;;  %v1086_v6 = vsel %vm1080_vm3, %v1083_v40, %v1085_v57  ;;  %v951_v23 = vor.u32 8388608, %v3162_v54  ;;  %v921_v24 = vcvt.s32.f32 %v914_v9  ;;  %2425 = vmatpush3.msra.mxu1 %v1570_v22 }
 0x1f1   :  { %v919_v21 = vand.u32 2147483647, %v918_v13  ;;  %v806_v27 = vsel %vm2251_vm8, 0, %v2250_v14  ;;  %v1105_v30 = vadd.s32 1, %v3215_v11  ;;  %v958_v33 = vsub.s32 32, %v957_v20  ;;  %v1569_v14 = vld [vmem:[%s3908_s6 + $0x10] sm:$0xff] }
 0x1f2   :  { %v928_v26 = vsel %vm3193_vm6, 0, %v3226_v18  ;;  %v791_v60 = vadd.s32 %v3131_v25, %v3139_v35  ;;  %v807_v34 = vsub.s32 32, %v806_v27  ;;  %v811_v36 = vsub.s32 4294967266, %v806_v27  ;;  %2426 = vmatprep.subr.mxu1 %v1569_v14 }
 0x1f3   :  { %v922_v38 = vmul.f32 %v921_v24, %v919_v21  ;;  %v808_v17 = vshll.u32 %v3183_v7, %v806_v27  ;;  %v1102_v40 = vmul.u32 %v3165_v4, %v1086_v6  ;;  %vm1104_vm9 = vc.u32 %v3230_v28, %v3214_v10  ;;  %2427 = vmatpush3.msra.mxu1 %v1569_v14 }
 0x1f4   :  { %v809_v54 = vshrl.u32 %v791_v60, %v807_v34  ;;  %v812_v47 = vadd.s32 127, %v811_v36  ;;  %v1106_v39 = vsel %vm1104_vm9, %v1105_v30, %v3215_v11  ;;  %v961_v49 = vshrl.u32 %v2577_v61, %v958_v33  ;;  %v1568_v30 = vld [vmem:[%s3908_s6 + $0x8] sm:$0xff] }
 0x1f5   :  { %v1107_v41 = vadd.s32 %v1106_v39, %v1102_v40  ;;  %v3247_v50 = vshrl.u32 %v955_v15, 5  ;;  %v964_v25 = vshrl.u32 %v2578_v63, %v958_v33  ;;  %v3250_v35 = vshll.u32 %v951_v23, 8  ;;  %2428 = vmatprep.subr.mxu1 %v1568_v30 }
 0x1f6   :  { %v810_v51 = vor.u32 %v809_v54, %v808_v17  ;;  %v813_v7 = vshll.u32 %v812_v47, 23  ;;  %v960_v4 = vshll.u32 %v2576_v59, %v957_v20  ;;  %v963_v52 = vshll.u32 %v2577_v61, %v957_v20  ;;  %2429 = vmatpush3.msra.mxu1 %v1568_v30  ;;  %v1567_v17 = vld [vmem:[%s3908_s6] sm:$0xff] }
 0x1f7   :  { %v923_v62 = vxor.u32 2147483648, %v922_v38  ;;  %v1108_v53 = vadd.s32 536870912, %v1107_v41  ;;  %v966_v31 = vshll.u32 %v2578_v63, %v957_v20  ;;  %v967_v1 = vshrl.u32 %v2579_v3, %v958_v33  ;;  %2430 = vmatprep.subr.mxu1 %v1567_v17 }
 0x1f8   :  { %v814_v58 = vor.u32 4788187, %v813_v7  ;;  %v959_v8 = vshrl.u32 %v2576_v59, %v958_v33  ;;  %v962_v57 = vor.u32 %v961_v49, %v960_v4  ;;  %v965_v12 = vor.u32 %v964_v25, %v963_v52  ;;  %2431 = vmatpush3.msra.mxu1 %v1567_v17 }
 0x1f9   :  { %vm737_vm10 = vcmp.lt.s32.totalorder %v3062_v55, 0  ;;  %v3261_v9 = vshrl.u32 %v1108_v53, 30  ;;  %v968_v46 = vor.u32 %v967_v1, %v966_v31  ;;  %v969_v11 = vshll.u32 %v2579_v3, %v957_v20  ;;  %2464 = vmatprep.subr.mxu1 %v3917_v0 }
 0x1fa   :  { %v970_v13 = vshrl.u32 %v2580_v5, %v958_v33  ;;  %v815_v15 = vand.u32 2147483647, %v814_v58  ;;  %v817_v19 = vcvt.s32.f32 %v810_v51  ;;  %v972_v21 = vshll.u32 %v2580_v5, %v957_v20 }
 0x1fb   :  { %v973_v6 = vshrl.u32 %v2581_v2, %v958_v33  ;;  %v924_v23 = vsel %vm841_vm0, %v923_v62, %v922_v38  ;;  %v1110_v24 = vshll.u32 %v3261_v9, 30  ;;  %vm975_vm11 = vcmp.lt.s32.totalorder %v3247_v50, 1  ;;  %v716_v62 = vpop.f32.mrf.mxu0 }
 0x1fc   :  { %v971_v27 = vor.u32 %v970_v13, %v969_v11  ;;  %v818_v60 = vmul.f32 %v817_v19, %v815_v15  ;;  %vm977_vm12 = vcmp.lt.s32.totalorder %v3247_v50, 3  ;;  %vm978_vm13 = vcmp.lt.s32.totalorder %v3247_v50, 4 }
 0x1fd   :  { %v974_v34 = vor.u32 %v973_v6, %v972_v21  ;;  %v3279_v20 = vsub.s32 %v1107_v41, %v1110_v24  ;;  %v980_v33 = vsel %vm978_vm13, %v968_v46, 2102212464  ;;  %v983_v36 = vsel %vm975_vm11, %v962_v57, %v965_v12  ;;  %v2423_v18 = vpop.f32.mrf.mxu0 }
 0x1fe   :  { %v984_v38 = vsel %vm978_vm13, %v971_v27, 920167782  ;;  %v819_v40 = vxor.u32 2147483648, %v818_v60  ;;  %vm976_vm14 = vcmp.lt.s32.totalorder %v3247_v50, 2  ;;  %v987_v47 = vsel %vm975_vm11, %v965_v12, %v968_v46 }
 0x1ff   :  { %v985_v54 = vsel %vm977_vm12, %v968_v46, %v984_v38  ;;  %v1113_v39 = vsub.s32 0, %v3279_v20  ;;  %v979_v49 = vsel %vm975_vm11, %v959_v8, %v962_v57  ;;  %v988_v25 = vsel %vm978_vm13, %v974_v34, 1326507024  ;;  %v726_v17 = vpop.f32.mrf.mxu0 }
 0x200   :  { %v986_v41 = vsel %vm976_vm14, %v983_v36, %v985_v54  ;;  %v981_v51 = vsel %vm977_vm12, %v965_v12, %v980_v33  ;;  %v989_v7 = vsel %vm977_vm12, %v971_v27, %v988_v25  ;;  %v927_v53 = vsel %vm3193_vm6, %v3057_v29, %v924_v23 }
 0x201   :  { %v3307_v4 = vmul.u32.u64.low %v3250_v35, %v986_v41  ;;  %v3308_v52 = vmul.u32.u64.high %v3250_v35, %v986_v41, %v3307_v4  ;;  %v2261_v31 = vmin.u32 %v1113_v39, %v3279_v20  ;;  %v990_v1 = vsel %vm976_vm14, %v987_v47, %v989_v7 }
 0x202   :  { %v1255_v22 = vand.u32 2147483647, %v3219_v16  ;;  %v820_v58 = vsel %vm737_vm10, %v819_v40, %v818_v60  ;;  %v3322_v8 = vmul.u32.u64.low %v3250_v35, %v990_v1  ;;  %v3323_v57 = vmul.u32.u64.high %v3250_v35, %v990_v1, %v3322_v8 }
 0x203   :  { %v1258_v12 = vand.u32 2139095040, %v3219_v16  ;;  %v1115_v46 = vclz %v2261_v31  ;;  %v982_v11 = vsel %vm976_vm14, %v979_v49, %v981_v51  ;;  %v3329_v13 = vadd.f32 %v3054_v32, %v716_v62 }
 0x204   :  { %v3335_v14 = vadd.s32 3, %v928_v26  ;;  %vm3339_vm15 = vcmp.le.f32.partialorder %v735_v37, 0.7853982  ;;  %v1001_v19 = vadd.s32 1, %v3308_v52  ;;  %2543 = vcosq.f32 %v927_v53 }
 0x205   :  { %v1259_v21 = vshrl.u32 %v1258_v12, 23  ;;  %v823_v50 = vsel %vm3339_vm15, %v3062_v55, %v820_v58  ;;  %v2262_v6 = vadd.s32 4294967294, %v1115_v46  ;;  %v1262_v45 = vand.u32 8388607, %v1255_v22 }
 0x206   :  { %v998_v26 = vmul.u32 %v3250_v35, %v982_v11  ;;  %vm1000_vm0 = vc.u32 %v3323_v57, %v3307_v4  ;;  %v1154_v23 = vand.u32 2139095040, %v3329_v13  ;;  %2545 = vsinq.f32 %v927_v53 }
 0x207   :  { %v2268_v37 = vadd.s32 4294967169, %v1259_v21  ;;  %v1103_v24 = vadd.s32 %v3214_v10, %v3230_v28  ;;  %vm2263_vm2 = vcmp.lt.s32.totalorder %v2262_v6, 0  ;;  %v1002_v27 = vsel %vm1000_vm0, %v1001_v19, %v3308_v52 }
 0x208   :  { %2547 = vcosq.f32 %v823_v50  ;;  %v1118_v30 = vsel %vm2263_vm2, 0, %v2262_v6  ;;  %v1003_v60 = vadd.s32 %v1002_v27, %v998_v26  ;;  %v1263_v35 = vor.u32 8388608, %v1262_v45 }
 0x209   :  { %v1265_v34 = vadd.s32 1, %v2268_v37  ;;  %v1119_v33 = vsub.s32 32, %v1118_v30  ;;  %v1123_v36 = vsub.s32 4294967266, %v1118_v30  ;;  %v1155_v38 = vshrl.u32 %v1154_v23, 23 }
 0x20a   :  { %2549 = vsinq.f32 %v823_v50  ;;  %v1004_v40 = vadd.s32 536870912, %v1003_v60  ;;  %v3357_v54 = vadd.f32 %v2423_v18, %v3054_v32  ;;  %v1120_v10 = vshll.u32 %v3279_v20, %v1118_v30 }
 0x20b   :  { %vm1266_vm3 = vcmp.gt.s32.totalorder %v1265_v34, 0  ;;  %v1121_v28 = vshrl.u32 %v1103_v24, %v1119_v33  ;;  %v1124_v47 = vadd.s32 127, %v1123_v36  ;;  %v1151_v25 = vand.u32 2147483647, %v3329_v13 }
 0x20c   :  { %v1267_v39 = vsel %vm1266_vm3, %v1265_v34, 0  ;;  %v3360_v49 = vshrl.u32 %v1004_v40, 30  ;;  %v3364_v51 = vadd.f32 %v3054_v32, %v726_v17  ;;  %v3366_v62 = vshll.u32 %v1263_v35, 8 }
 0x20d   :  { %v1269_v41 = vand.u32 31, %v1267_v39  ;;  %v1122_v7 = vor.u32 %v1121_v28, %v1120_v10  ;;  %v1125_v52 = vshll.u32 %v1124_v47, 23  ;;  %v2264_v53 = vadd.s32 4294967169, %v1155_v38 }
 0x20e   :  { %v1006_v31 = vshll.u32 %v3360_v49, 30  ;;  %v3369_v1 = vshrl.u32 %v1267_v39, 5  ;;  %vm1049_vm4 = vcmp.lt.s32.totalorder %v3071_v48, 0  ;;  %v1158_v36 = vand.u32 8388607, %v1151_v25 }
 0x20f   :  { %v1270_v20 = vsub.s32 32, %v1269_v41  ;;  %v1272_v58 = vshll.u32 %v2576_v59, %v1269_v41  ;;  %v1126_v8 = vor.u32 4788187, %v1125_v52  ;;  %v1129_v12 = vcvt.s32.f32 %v1122_v7 }
 0x210   :  { %v1275_v46 = vshll.u32 %v2577_v61, %v1269_v41  ;;  %v1278_v11 = vshll.u32 %v2578_v63, %v1269_v41  ;;  %v3374_v32 = vsub.s32 %v1003_v60, %v1006_v31  ;;  %v1281_v50 = vshll.u32 %v2579_v3, %v1269_v41 }
 0x211   :  { %v1273_v19 = vshrl.u32 %v2577_v61, %v1270_v20  ;;  %v1276_v21 = vshrl.u32 %v2578_v63, %v1270_v20  ;;  %v1127_v6 = vand.u32 2147483647, %v1126_v8  ;;  %v1279_v45 = vshrl.u32 %v2579_v3, %v1270_v20  ;;  %v3383_v37 = vpop.eup %2543 }
 0x212   :  { %v1282_v18 = vshrl.u32 %v2580_v5, %v1270_v20  ;;  %v1284_v26 = vshll.u32 %v2580_v5, %v1269_v41  ;;  %v1009_v23 = vsub.s32 0, %v3374_v32  ;;  %v1285_v30 = vshrl.u32 %v2581_v2, %v1270_v20 }
 0x213   :  { %v1274_v24 = vor.u32 %v1273_v19, %v1272_v58  ;;  %v1277_v27 = vor.u32 %v1276_v21, %v1275_v46  ;;  %v1130_v60 = vmul.f32 %v1129_v12, %v1127_v6  ;;  %v1280_v34 = vor.u32 %v1279_v45, %v1278_v11  ;;  %v3389_v35 = vpop.eup %2545 }
 0x214   :  { %v1283_v33 = vor.u32 %v1282_v18, %v1281_v50  ;;  %v2257_v38 = vmin.u32 %v1009_v23, %v3374_v32  ;;  %v1286_v17 = vor.u32 %v1285_v30, %v1284_v26  ;;  %vm1287_vm5 = vcmp.lt.s32.totalorder %v3369_v1, 1 }
 0x215   :  { %v1161_v40 = vadd.s32 1, %v2264_v53  ;;  %v3393_v10 = vpop.eup %2547  ;;  %vm3397_vm6 = vcmp.le.f32.partialorder %v1047_v42, 0.7853982  ;;  %v1271_v47 = vshrl.u32 %v2576_v59, %v1270_v20  ;;  %vm1289_vm7 = vcmp.lt.s32.totalorder %v3369_v1, 3 }
 0x216   :  { %vm1290_vm8 = vcmp.lt.s32.totalorder %v3369_v1, 4  ;;  %v1295_v39 = vsel %vm1287_vm5, %v1274_v24, %v1277_v27  ;;  %v1131_v41 = vxor.u32 2147483648, %v1130_v60  ;;  %v1011_v7 = vclz %v2257_v38 }
 0x217   :  { %v1292_v52 = vsel %vm1290_vm8, %v1280_v34, 2102212464  ;;  %v1296_v53 = vsel %vm1290_vm8, %v1283_v33, 920167782  ;;  %v3406_v31 = vpop.eup %2549  ;;  %vm1288_vm9 = vcmp.lt.s32.totalorder %v3369_v1, 2  ;;  %v1299_v20 = vsel %vm1287_vm5, %v1277_v27, %v1280_v34 }
 0x218   :  { %v1297_v42 = vsel %vm1289_vm7, %v1280_v34, %v1296_v53  ;;  %v1300_v58 = vsel %vm1290_vm8, %v1286_v17, 1326507024  ;;  %v2258_v8 = vadd.s32 4294967294, %v1011_v7  ;;  %v1291_v12 = vsel %vm1287_vm5, %v1271_v47, %v1274_v24 }
 0x219   :  { %v1298_v46 = vsel %vm1288_vm9, %v1295_v39, %v1297_v42  ;;  %v1159_v11 = vor.u32 8388608, %v1158_v36  ;;  %v1293_v19 = vsel %vm1289_vm7, %v1277_v27, %v1292_v52  ;;  %v1301_v21 = vsel %vm1289_vm7, %v1283_v33, %v1300_v58 }
 0x21a   :  { %v3422_v50 = vmul.u32.u64.low %v3366_v62, %v1298_v46  ;;  %v3423_v6 = vmul.u32.u64.high %v3366_v62, %v1298_v46, %v3422_v50  ;;  %v1132_v45 = vsel %vm1049_vm4, %v1131_v41, %v1130_v60  ;;  %v999_v18 = vadd.s32 %v3307_v4, %v3323_v57 }
 0x21b   :  { %vm2259_vm11 = vcmp.lt.s32.totalorder %v2258_v8, 0  ;;  %v1302_v26 = vsel %vm1288_vm9, %v1299_v20, %v1301_v21  ;;  %vm1162_vm12 = vcmp.gt.s32.totalorder %v1161_v40, 0  ;;  %v1294_v33 = vsel %vm1288_vm9, %v1291_v12, %v1293_v19 }
 0x21c   :  { %v1014_v23 = vsel %vm2259_vm11, 0, %v2258_v8  ;;  %v3433_v24 = vmul.u32.u64.low %v3366_v62, %v1302_v26  ;;  %v3434_v27 = vmul.u32.u64.high %v3366_v62, %v1302_v26, %v3433_v24  ;;  %v1163_v36 = vsel %vm1162_vm12, %v1161_v40, 0 }
 0x21d   :  { %v1015_v30 = vsub.s32 32, %v1014_v23  ;;  %v1019_v34 = vsub.s32 4294967266, %v1014_v23  ;;  %v1313_v60 = vadd.s32 1, %v3423_v6  ;;  %v1165_v38 = vand.u32 31, %v1163_v36 }
 0x21e   :  { %v3439_v4 = vshll.u32 %v1159_v11, 8  ;;  %v3920_v57 = vand.u32 2147483647, %v3357_v54  ;;  %v3445_v17 = vsel %vm3397_vm6, %v3071_v48, %v1132_v45  ;;  %v1016_v47 = vshll.u32 %v3374_v32, %v1014_v23 }
 0x21f   :  { %v1017_v39 = vshrl.u32 %v999_v18, %v1015_v30  ;;  %v1020_v41 = vadd.s32 127, %v1019_v34  ;;  %v1310_v1 = vmul.u32 %v3366_v62, %v1294_v33  ;;  %vm1312_vm13 = vc.u32 %v3434_v27, %v3422_v50 }
 0x220   :  { %v1164_v40 = vshrl.u32 %v1163_v36, 5  ;;  %v1166_v7 = vsub.s32 32, %v1165_v38  ;;  %v1314_v42 = vsel %vm1312_vm13, %v1313_v60, %v3423_v6  ;;  %v1168_v20 = vshll.u32 %v2576_v59, %v1165_v38 }
 0x221   :  { %v1018_v52 = vor.u32 %v1017_v39, %v1016_v47  ;;  %v1021_v53 = vshll.u32 %v1020_v41, 23  ;;  %v1315_v58 = vadd.s32 %v1314_v42, %v1310_v1  ;;  %v1171_v32 = vshll.u32 %v2577_v61, %v1165_v38 }
 0x222   :  { %v1169_v8 = vshrl.u32 %v2577_v61, %v1166_v7  ;;  %v1172_v12 = vshrl.u32 %v2578_v63, %v1166_v7  ;;  %vm945_vm14 = vcmp.lt.s32.totalorder %v3080_v56, 0  ;;  %v1174_v46 = vshll.u32 %v2578_v63, %v1165_v38 }
 0x223   :  { %v1022_v62 = vor.u32 4788187, %v1021_v53  ;;  %v1175_v11 = vshrl.u32 %v2579_v3, %v1166_v7  ;;  %v1466_v19 = vand.u32 2139095040, %v3357_v54  ;;  %v1025_v21 = vcvt.s32.f32 %v1018_v52 }
 0x224   :  { %v1316_v6 = vadd.s32 536870912, %v1315_v58  ;;  %v1170_v45 = vor.u32 %v1169_v8, %v1168_v20  ;;  %v1173_v18 = vor.u32 %v1172_v12, %v1171_v32  ;;  %v1177_v24 = vshll.u32 %v2579_v3, %v1165_v38 }
 0x225   :  { %v1023_v26 = vand.u32 2147483647, %v1022_v62  ;;  %v1176_v23 = vor.u32 %v1175_v11, %v1174_v46  ;;  %v1178_v30 = vshrl.u32 %v2580_v5, %v1166_v7  ;;  %vm3464_vm0 = vcmp.le.f32.partialorder %v943_v43, 0.7853982 }
 0x226   :  { %v3468_v33 = vshrl.u32 %v1316_v6, 30  ;;  %v1180_v36 = vshll.u32 %v2580_v5, %v1165_v38  ;;  %v1181_v60 = vshrl.u32 %v2581_v2, %v1166_v7  ;;  %v1470_v47 = vand.u32 8388607, %v3920_v57 }
 0x227   :  { %v1026_v39 = vmul.f32 %v1025_v21, %v1023_v26  ;;  %v1167_v41 = vshrl.u32 %v2576_v59, %v1166_v7  ;;  %v1179_v1 = vor.u32 %v1178_v30, %v1177_v24  ;;  %vm1186_vm2 = vcmp.lt.s32.totalorder %v1164_v40, 4 }
 0x228   :  { %v1318_v52 = vshll.u32 %v3468_v33, 30  ;;  %v1182_v43 = vor.u32 %v1181_v60, %v1180_v36  ;;  %vm1183_vm3 = vcmp.lt.s32.totalorder %v1164_v40, 1  ;;  %v1188_v53 = vsel %vm1186_vm2, %v1176_v23, 2102212464 }
 0x229   :  { %v1027_v42 = vxor.u32 2147483648, %v1026_v39  ;;  %vm1185_vm5 = vcmp.lt.s32.totalorder %v1164_v40, 3  ;;  %v1191_v20 = vsel %vm1183_vm3, %v1170_v45, %v1173_v18  ;;  %v1192_v38 = vsel %vm1186_vm2, %v1179_v1, 920167782 }
 0x22a   :  { %v3478_v8 = vsub.s32 %v1315_v58, %v1318_v52  ;;  %vm1184_vm7 = vcmp.lt.s32.totalorder %v1164_v40, 2  ;;  %v1193_v32 = vsel %vm1185_vm5, %v1176_v23, %v1192_v38  ;;  %v1195_v12 = vsel %vm1183_vm3, %v1173_v18, %v1176_v23 }
 0x22b   :  { %v1187_v62 = vsel %vm1183_vm3, %v1167_v41, %v1170_v45  ;;  %v1189_v7 = vsel %vm1185_vm5, %v1173_v18, %v1188_v53  ;;  %v1194_v46 = vsel %vm1184_vm7, %v1191_v20, %v1193_v32  ;;  %v1196_v11 = vsel %vm1186_vm2, %v1182_v43, 1326507024 }
 0x22c   :  { %v1028_v21 = vsel %vm945_vm14, %v1027_v42, %v1026_v39  ;;  %v1321_v6 = vsub.s32 0, %v3478_v8  ;;  %v1197_v26 = vsel %vm1185_vm5, %v1179_v1, %v1196_v11  ;;  %v1467_v24 = vshrl.u32 %v1466_v19, 23 }
 0x22d   :  { %2551 = vcosq.f32 %v3445_v17  ;;  %v1198_v30 = vsel %vm1184_vm7, %v1195_v12, %v1197_v26  ;;  %v3486_v58 = vmul.u32.u64.low %v3439_v4, %v1194_v46  ;;  %v3487_v36 = vmul.u32.u64.high %v3439_v4, %v1194_v46, %v3486_v58 }
 0x22e   :  { %v2269_v45 = vmin.u32 %v1321_v6, %v3478_v8  ;;  %v1190_v18 = vsel %vm1184_vm7, %v1187_v62, %v1189_v7  ;;  %v3492_v40 = vmul.u32.u64.low %v3439_v4, %v1198_v30  ;;  %v3493_v23 = vmul.u32.u64.high %v3439_v4, %v1198_v30, %v3492_v40 }
 0x22f   :  { %v3498_v60 = vsel %vm3464_vm0, %v3080_v56, %v1028_v21  ;;  %v2276_v19 = vadd.s32 4294967169, %v1467_v24  ;;  %v1471_v39 = vor.u32 8388608, %v1470_v47  ;;  %v3919_v41 = vand.u32 2147483647, %v3364_v51 }
 0x230   :  { %2553 = vsinq.f32 %v3445_v17  ;;  %v1323_v1 = vclz %v2269_v45  ;;  %v1362_v52 = vand.u32 2139095040, %v3364_v51  ;;  %v821_v43 = vsub.s32 4, %v3170_v44 }
 0x231   :  { %v1311_v53 = vadd.s32 %v3422_v50, %v3434_v27  ;;  %v1206_v42 = vmul.u32 %v3439_v4, %v1190_v18  ;;  %v1209_v20 = vadd.s32 1, %v3487_v36  ;;  %v1473_v38 = vadd.s32 1, %v2276_v19 }
 0x232   :  { %2555 = vcosq.f32 %v3498_v60  ;;  %v2270_v47 = vadd.s32 4294967294, %v1323_v1  ;;  %vm1208_vm8 = vc.u32 %v3493_v23, %v3486_v58  ;;  %v1363_v17 = vshrl.u32 %v1362_v52, 23 }
 0x233   :  { %v1210_v32 = vsel %vm1208_vm8, %v1209_v20, %v3487_v36  ;;  %vm1474_vm9 = vcmp.gt.s32.totalorder %v1473_v38, 0  ;;  %v3512_v12 = vshll.u32 %v1471_v39, 8  ;;  %v3516_v50 = vand.u32 8388607, %v3919_v41 }
 0x234   :  { %vm2271_vm11 = vcmp.lt.s32.totalorder %v2270_v47, 0  ;;  %v1211_v27 = vadd.s32 %v1210_v32, %v1206_v42  ;;  %v1475_v4 = vsel %vm1474_vm9, %v1473_v38, 0  ;;  %v3521_v62 = vsel %vm737_vm10, %v821_v43, %v3170_v44 }
 0x235   :  { %v1326_v7 = vsel %vm2271_vm11, 0, %v2270_v47  ;;  %v1476_v46 = vshrl.u32 %v1475_v4, 5  ;;  %v1477_v11 = vand.u32 31, %v1475_v4  ;;  %v2272_v21 = vadd.s32 4294967169, %v1363_v17 }
 0x236   :  { %v1327_v6 = vsub.s32 32, %v1326_v7  ;;  %v1328_v26 = vshll.u32 %v3478_v8, %v1326_v7  ;;  %v1331_v24 = vsub.s32 4294967266, %v1326_v7  ;;  %v1212_v30 = vadd.s32 536870912, %v1211_v27 }
 0x237   :  { %v1478_v36 = vsub.s32 32, %v1477_v11  ;;  %v1480_v45 = vshll.u32 %v2576_v59, %v1477_v11  ;;  %v1483_v18 = vshll.u32 %v2577_v61, %v1477_v11  ;;  %v1486_v40 = vshll.u32 %v2578_v63, %v1477_v11 }
 0x238   :  { %v1329_v19 = vshrl.u32 %v1311_v53, %v1327_v6  ;;  %v1332_v39 = vadd.s32 127, %v1331_v24  ;;  %v3527_v44 = vshrl.u32 %v1212_v30, 30  ;;  %v1489_v1 = vshll.u32 %v2579_v3, %v1477_v11 }
 0x239   :  { %v1479_v52 = vshrl.u32 %v2576_v59, %v1478_v36  ;;  %v1481_v43 = vshrl.u32 %v2577_v61, %v1478_v36  ;;  %v1484_v8 = vshrl.u32 %v2578_v63, %v1478_v36  ;;  %v1487_v42 = vshrl.u32 %v2579_v3, %v1478_v36 }
 0x23a   :  { %v3534_v20 = vpop.eup %2551  ;;  %v1330_v38 = vor.u32 %v1329_v19, %v1328_v26  ;;  %v1333_v47 = vshll.u32 %v1332_v39, 23  ;;  %v1214_v17 = vshll.u32 %v3527_v44, 30  ;;  %v1490_v53 = vshrl.u32 %v2580_v5, %v1478_v36 }
 0x23b   :  { %vm1257_vm10 = vcmp.lt.s32.totalorder %v3219_v16, 0  ;;  %v1482_v32 = vor.u32 %v1481_v43, %v1480_v45  ;;  %v1485_v4 = vor.u32 %v1484_v8, %v1483_v18  ;;  %v1488_v7 = vor.u32 %v1487_v42, %v1486_v40 }
 0x23c   :  { %v1492_v6 = vshll.u32 %v2580_v5, %v1477_v11  ;;  %v1334_v24 = vor.u32 4788187, %v1333_v47  ;;  %v1337_v30 = vcvt.s32.f32 %v1330_v38  ;;  %v3540_v0 = vsub.s32 %v1211_v27, %v1214_v17 }
 0x23d   :  { %v1491_v41 = vor.u32 %v1490_v53, %v1489_v1  ;;  %v3542_v57 = vpop.eup %2553  ;;  %v1493_v26 = vshrl.u32 %v2581_v2, %v1478_v36  ;;  %vm1495_vm12 = vcmp.lt.s32.totalorder %v1476_v46, 1  ;;  %vm1496_vm13 = vcmp.lt.s32.totalorder %v1476_v46, 2 }
 0x23e   :  { %vm1497_vm2 = vcmp.lt.s32.totalorder %v1476_v46, 3  ;;  %vm3547_vm3 = vcmp.le.f32.partialorder %v1255_v22, 0.7853982  ;;  %v1335_v18 = vand.u32 2147483647, %v1334_v24  ;;  %v1217_v11 = vsub.s32 0, %v3540_v0 }
 0x23f   :  { %vm1498_vm5 = vcmp.lt.s32.totalorder %v1476_v46, 4  ;;  %v1499_v27 = vsel %vm1495_vm12, %v1479_v52, %v1482_v32  ;;  %v3553_v40 = vpop.eup %2555  ;;  %v1494_v19 = vor.u32 %v1493_v26, %v1492_v6  ;;  %v1503_v36 = vsel %vm1495_vm12, %v1482_v32, %v1485_v4 }
 0x240   :  { %v1500_v39 = vsel %vm1498_vm5, %v1488_v7, 2102212464  ;;  %v1504_v1 = vsel %vm1498_vm5, %v1491_v41, 920167782  ;;  %v1338_v43 = vmul.f32 %v1337_v30, %v1335_v18  ;;  %v2265_v8 = vmin.u32 %v1217_v11, %v3540_v0 }
 0x241   :  { %v1501_v22 = vsel %vm1497_vm2, %v1485_v4, %v1500_v39  ;;  %v1505_v42 = vsel %vm1497_vm2, %v1488_v7, %v1504_v1  ;;  %v1507_v47 = vsel %vm1495_vm12, %v1485_v4, %v1488_v7  ;;  %v1508_v17 = vsel %vm1498_vm5, %v1494_v19, 1326507024 }
 0x242   :  { %v1506_v38 = vsel %vm1496_vm13, %v1503_v36, %v1505_v42  ;;  %v1367_v52 = vor.u32 8388608, %v3516_v50  ;;  %v1339_v53 = vxor.u32 2147483648, %v1338_v43  ;;  %v1219_v6 = vclz %v2265_v8 }
 0x243   :  { %v1502_v24 = vsel %vm1496_vm13, %v1499_v27, %v1501_v22  ;;  %v1509_v32 = vsel %vm1497_vm2, %v1491_v41, %v1508_v17  ;;  %v3566_v26 = vmul.u32.u64.low %v3512_v12, %v1506_v38  ;;  %v3567_v18 = vmul.u32.u64.high %v3512_v12, %v1506_v38, %v3566_v26 }
 0x244   :  { %v1510_v30 = vsel %vm1496_vm13, %v1507_v47, %v1509_v32  ;;  %v1369_v11 = vadd.s32 1, %v2272_v21  ;;  %v1340_v4 = vsel %vm1257_vm10, %v1339_v53, %v1338_v43  ;;  %v2266_v7 = vadd.s32 4294967294, %v1219_v6 }
 0x245   :  { %v3573_v50 = vmul.u32.u64.low %v3512_v12, %v1510_v30  ;;  %v3574_v19 = vmul.u32.u64.high %v3512_v12, %v1510_v30, %v3573_v50  ;;  %2557 = vsinq.f32 %v3498_v60  ;;  %v824_v41 = vsel %vm3339_vm15, 0, %v3521_v62 }
 0x246   :  { %vm1370_vm7 = vcmp.gt.s32.totalorder %v1369_v11, 0  ;;  %v832_v46 = vxor.u32 2147483648, %v3406_v31  ;;  %v1207_v21 = vadd.s32 %v3486_v58, %v3493_v23  ;;  %vm2267_vm8 = vcmp.lt.s32.totalorder %v2266_v7, 0 }
 0x247   :  { %v1518_v27 = vmul.u32 %v3512_v12, %v1502_v24  ;;  %v1371_v39 = vsel %vm1370_vm7, %v1369_v11, 0  ;;  %v3587_v36 = vsel %vm3547_vm3, %v3219_v16, %v1340_v4  ;;  %v1222_v60 = vsel %vm2267_vm8, 0, %v2266_v7 }
 0x248   :  { %v1521_v1 = vadd.s32 1, %v3567_v18  ;;  %v3590_v43 = vshrl.u32 %v1371_v39, 5  ;;  %v1223_v15 = vsub.s32 32, %v1222_v60  ;;  %v1227_v62 = vsub.s32 4294967266, %v1222_v60 }
 0x249   :  { %v3592_v8 = vshll.u32 %v1367_v52, 8  ;;  %v828_v22 = vadd.s32 3, %v824_v41  ;;  %v1224_v58 = vshll.u32 %v3540_v0, %v1222_v60  ;;  %vm1520_vm15 = vc.u32 %v3574_v19, %v3566_v26 }
 0x24a   :  { %v1373_v23 = vand.u32 31, %v1371_v39  ;;  %vm1391_vm9 = vcmp.lt.s32.totalorder %v3590_v43, 1  ;;  %v1225_v12 = vshrl.u32 %v1207_v21, %v1223_v15  ;;  %v1228_v42 = vadd.s32 127, %v1227_v62 }
 0x24b   :  { %v1522_v38 = vsel %vm1520_vm15, %v1521_v1, %v3567_v18  ;;  %vm1393_vm11 = vcmp.lt.s32.totalorder %v3590_v43, 3  ;;  %vm1392_vm12 = vcmp.lt.s32.totalorder %v3590_v43, 2  ;;  %vm1153_vm13 = vcmp.lt.s32.totalorder %v3329_v13, 0 }
 0x24c   :  { %v1523_v47 = vadd.s32 %v1522_v38, %v1518_v27  ;;  %v1374_v17 = vsub.s32 32, %v1373_v23  ;;  %v1376_v52 = vshll.u32 %v2576_v59, %v1373_v23  ;;  %v1379_v53 = vshll.u32 %v2577_v61, %v1373_v23 }
 0x24d   :  { %v1226_v0 = vor.u32 %v1225_v12, %v1224_v58  ;;  %v1229_v6 = vshll.u32 %v1228_v42, 23  ;;  %v1382_v24 = vshll.u32 %v2578_v63, %v1373_v23  ;;  %v1385_v32 = vshll.u32 %v2579_v3, %v1373_v23 }
 0x24e   :  { %v1524_v30 = vadd.s32 536870912, %v1523_v47  ;;  %v1375_v18 = vshrl.u32 %v2576_v59, %v1374_v17  ;;  %v1377_v11 = vshrl.u32 %v2577_v61, %v1374_v17  ;;  %v1380_v4 = vshrl.u32 %v2578_v63, %v1374_v17 }
 0x24f   :  { %vm3611_vm2 = vcmp.le.f32.partialorder %v1151_v25, 0.7853982  ;;  %v1230_v50 = vor.u32 4788187, %v1229_v6  ;;  %v1233_v41 = vcvt.s32.f32 %v1226_v0  ;;  %v1383_v21 = vshrl.u32 %v2579_v3, %v1374_v17 }
 0x250   :  { %v1386_v27 = vshrl.u32 %v2580_v5, %v1374_v17  ;;  %v3617_v39 = vshrl.u32 %v1524_v30, 30  ;;  %v1378_v60 = vor.u32 %v1377_v11, %v1376_v52  ;;  %v1381_v59 = vor.u32 %v1380_v4, %v1379_v53 }
 0x251   :  { %v1388_v61 = vshll.u32 %v2580_v5, %v1373_v23  ;;  %v1231_v1 = vand.u32 2147483647, %v1230_v50  ;;  %v1384_v63 = vor.u32 %v1383_v21, %v1382_v24  ;;  %v1389_v25 = vshrl.u32 %v2581_v2, %v1374_v17 }
 0x252   :  { %v1387_v15 = vor.u32 %v1386_v27, %v1385_v32  ;;  %v1526_v62 = vshll.u32 %v3617_v39, 30  ;;  %vm1394_vm5 = vcmp.lt.s32.totalorder %v3590_v43, 4  ;;  %v1395_v3 = vsel %vm1391_vm9, %v1375_v18, %v1378_v60  ;;  %v3627_v12 = vpop.eup %2557 }
 0x253   :  { %v1399_v58 = vsel %vm1391_vm9, %v1378_v60, %v1381_v59  ;;  %v1234_v42 = vmul.f32 %v1233_v41, %v1231_v1  ;;  %v1390_v38 = vor.u32 %v1389_v25, %v1388_v61  ;;  %v1396_v5 = vsel %vm1394_vm5, %v1384_v63, 2102212464 }
 0x254   :  { %v1400_v23 = vsel %vm1394_vm5, %v1387_v15, 920167782  ;;  %v3629_v52 = vsub.s32 %v1523_v47, %v1526_v62  ;;  %v1397_v2 = vsel %vm1393_vm11, %v1381_v59, %v1396_v5  ;;  %v1403_v53 = vsel %vm1391_vm9, %v1381_v59, %v1384_v63 }
 0x255   :  { %v1401_v17 = vsel %vm1393_vm11, %v1384_v63, %v1400_v23  ;;  %v1235_v0 = vxor.u32 2147483648, %v1234_v42  ;;  %v1398_v6 = vsel %vm1392_vm12, %v1395_v3, %v1397_v2  ;;  %v1404_v32 = vsel %vm1394_vm5, %v1390_v38, 1326507024 }
 0x256   :  { %v1402_v24 = vsel %vm1392_vm12, %v1399_v58, %v1401_v17  ;;  %v1529_v47 = vsub.s32 0, %v3629_v52  ;;  %v1405_v30 = vsel %vm1393_vm11, %v1387_v15, %v1404_v32  ;;  %2559 = vcosq.f32 %v3587_v36 }
 0x257   :  { %v3645_v18 = vmul.u32.u64.low %v3592_v8, %v1402_v24  ;;  %v3646_v11 = vmul.u32.u64.high %v3592_v8, %v1402_v24, %v3645_v18  ;;  %v1236_v4 = vsel %vm1153_vm13, %v1235_v0, %v1234_v42  ;;  %v1406_v50 = vsel %vm1392_vm12, %v1403_v53, %v1405_v30 }
 0x258   :  { %v829_v41 = vand.u32 3, %v828_v22  ;;  %v1239_v21 = vsel %vm3611_vm2, %v3329_v13, %v1236_v4  ;;  %v2277_v27 = vmin.u32 %v1529_v47, %v3629_v52  ;;  %v1519_v61 = vadd.s32 %v3566_v26, %v3574_v19 }
 0x259   :  { %v3659_v60 = vmul.u32.u64.low %v3592_v8, %v1406_v50  ;;  %v3660_v59 = vmul.u32.u64.high %v3592_v8, %v1406_v50, %v3659_v60  ;;  %2561 = vcosq.f32 %v1239_v21  ;;  %v1414_v1 = vmul.u32 %v3592_v8, %v1398_v6 }
 0x25a   :  { %vm827_vm7 = vweird.f32 %v3062_v55  ;;  %v1531_v43 = vclz %v2277_v27  ;;  %v1417_v22 = vadd.s32 1, %v3646_v11  ;;  %vm830_vm8 = vcmp.lt.s32.totalorder %v829_v41, 2 }
 0x25b   :  { %vm831_vm15 = vcmp.eq.s32.totalorder %v829_v41, 0  ;;  %vm931_vm9 = vweird.f32 %v3057_v29  ;;  %v835_v15 = vxor.u32 2147483648, %v3393_v10  ;;  %v933_v25 = vand.u32 3, %v3335_v14 }
 0x25c   :  { %v833_v63 = vsel %vm831_vm15, %v3393_v10, %v832_v46  ;;  %v936_v26 = vxor.u32 2147483648, %v3389_v35  ;;  %v2278_v19 = vadd.s32 4294967294, %v1531_v43  ;;  %vm1416_vm11 = vc.u32 %v3660_v59, %v3645_v18 }
 0x25d   :  { %vm834_vm12 = vcmp.eq.s32.totalorder %v829_v41, 2  ;;  %v1029_v8 = vsub.s32 4, %v3360_v49  ;;  %2563 = vsinq.f32 %v1239_v21  ;;  %v1418_v62 = vsel %vm1416_vm11, %v1417_v22, %v3646_v11 }
 0x25e   :  { %v836_v3 = vsel %vm834_vm12, %v835_v15, %v3406_v31  ;;  %v939_v46 = vxor.u32 2147483648, %v3383_v37  ;;  %vm2279_vm5 = vcmp.lt.s32.totalorder %v2278_v19, 0  ;;  %v1419_v10 = vadd.s32 %v1418_v62, %v1414_v1 }
 0x25f   :  { %v837_v14 = vsel %vm830_vm8, %v833_v63, %v836_v3  ;;  %vm935_vm15 = vcmp.eq.s32.totalorder %v933_v25, 0  ;;  %v1534_v58 = vsel %vm2279_vm5, 0, %v2278_v19  ;;  %v1030_v5 = vsel %vm945_vm14, %v1029_v8, %v3360_v49 }
 0x260   :  { %v838_v42 = vsel %vm827_vm7, nan, %v837_v14  ;;  %v937_v38 = vsel %vm935_vm15, %v3383_v37, %v936_v26  ;;  %v1535_v23 = vsub.s32 32, %v1534_v58  ;;  %v1539_v2 = vsub.s32 4294967266, %v1534_v58 }
 0x261   :  { %v1420_v31 = vadd.s32 536870912, %v1419_v10  ;;  %2432 = vmatprep.mubr.msk.f32.mxu1 %vm605_vm1, %v838_v42  ;;  %vm938_vm11 = vcmp.eq.s32.totalorder %v933_v25, 2  ;;  %2565 = vsinq.f32 %v3587_v36  ;;  %vm934_vm8 = vcmp.lt.s32.totalorder %v933_v25, 2 }
 0x262   :  { %v940_v17 = vsel %vm938_vm11, %v939_v46, %v3389_v35  ;;  %v1032_v55 = vsel %vm3464_vm0, 0, %v1030_v5  ;;  %v1537_v53 = vshrl.u32 %v1519_v61, %v1535_v23  ;;  %v1540_v37 = vadd.s32 127, %v1539_v2 }
 0x263   :  { %v3692_v0 = vshrl.u32 %v1420_v31, 30  ;;  %v941_v6 = vsel %vm934_vm8, %v937_v38, %v940_v17  ;;  %v1536_v49 = vshll.u32 %v3629_v52, %v1534_v58  ;;  %v1036_v32 = vadd.s32 3, %v1032_v55  ;;  %v3698_v36 = vpop.eup %2559 }
 0x264   :  { %v942_v24 = vsel %vm931_vm9, nan, %v941_v6  ;;  %v1133_v47 = vsub.s32 4, %v3261_v9  ;;  %v1541_v30 = vshll.u32 %v1540_v37, 23  ;;  %v1040_v34 = vxor.u32 2147483648, %v3627_v12 }
 0x265   :  { %v1422_v35 = vshll.u32 %v3692_v0, 30  ;;  %2433 = vmatmul.mubr.msk.f32.vlgmr.msra.gmra.mxu1 %vm605_vm1, %v942_v24  ;;  %v1043_v11 = vxor.u32 2147483648, %v3553_v40  ;;  %v1538_v4 = vor.u32 %v1537_v53, %v1536_v49  ;;  %vm1035_vm14 = vweird.f32 %v3080_v56 }
 0x266   :  { %v1037_v52 = vand.u32 3, %v1036_v32  ;;  %v1134_v29 = vsel %vm1049_vm4, %v1133_v47, %v3261_v9  ;;  %v3708_v50 = vpop.eup %2561  ;;  %v1542_v41 = vor.u32 4788187, %v1541_v30  ;;  %v1144_v60 = vxor.u32 2147483648, %v3542_v57 }
 0x267   :  { %v3710_v21 = vsub.s32 %v1419_v10, %v1422_v35  ;;  %v1136_v27 = vsel %vm3397_vm6, 0, %v1134_v29  ;;  %v1147_v1 = vxor.u32 2147483648, %v3534_v20  ;;  %v1237_v28 = vsub.s32 4, %v3527_v44 }
 0x268   :  { %vm1039_vm0 = vcmp.eq.s32.totalorder %v1037_v52, 0  ;;  %vm1042_vm7 = vcmp.eq.s32.totalorder %v1037_v52, 2  ;;  %v1140_v61 = vadd.s32 3, %v1136_v27  ;;  %vm1038_vm9 = vcmp.lt.s32.totalorder %v1037_v52, 2 }
 0x269   :  { %v1425_v43 = vsub.s32 0, %v3710_v21  ;;  %v1041_v9 = vsel %vm1039_vm0, %v3553_v40, %v1040_v34  ;;  %v1044_v22 = vsel %vm1042_vm7, %v1043_v11, %v3627_v12  ;;  %v1543_v63 = vand.u32 2147483647, %v1542_v41 }
 0x26a   :  { %v1045_v15 = vsel %vm1038_vm9, %v1041_v9, %v1044_v22  ;;  %v1141_v25 = vand.u32 3, %v1140_v61  ;;  %v2564_v26 = vpop.eup %2563  ;;  %vm1139_vm4 = vweird.f32 %v3071_v48  ;;  %v1545_v62 = vcvt.s32.f32 %v1538_v4 }
 0x26b   :  { %v2273_v19 = vmin.u32 %v1425_v43, %v3710_v21  ;;  %v1046_v8 = vsel %vm1035_vm14, nan, %v1045_v15  ;;  %v1238_v40 = vsel %vm1153_vm13, %v1237_v28, %v3527_v44  ;;  %v1341_v58 = vsub.s32 4, %v3468_v33 }
 0x26c   :  { %2435 = vmatprep.mubr.msk.f32.mxu1 %vm605_vm1, %v1046_v8  ;;  %vm1143_vm6 = vcmp.eq.s32.totalorder %v1141_v25, 0  ;;  %vm1146_vm12 = vcmp.eq.s32.totalorder %v1141_v25, 2  ;;  %vm1142_vm5 = vcmp.lt.s32.totalorder %v1141_v25, 2  ;;  %v1546_v10 = vmul.f32 %v1545_v62, %v1543_v63 }
 0x26d   :  { %v1427_v12 = vclz %v2273_v19  ;;  %v1145_v3 = vsel %vm1143_vm6, %v3534_v20, %v1144_v60  ;;  %v1148_v46 = vsel %vm1146_vm12, %v1147_v1, %v3542_v57  ;;  %v1240_v14 = vsel %vm3611_vm2, 0, %v1238_v40 }
 0x26e   :  { %v1149_v56 = vsel %vm1142_vm5, %v1145_v3, %v1148_v46  ;;  %v2566_v42 = vpop.eup %2565  ;;  %vm1465_vm15 = vcmp.lt.s32.totalorder %v3357_v54, 0  ;;  %v1244_v5 = vadd.s32 3, %v1240_v14  ;;  %v1415_v20 = vadd.s32 %v3645_v18, %v3660_v59 }
 0x26f   :  { %v2274_v38 = vadd.s32 4294967294, %v1427_v12  ;;  %v1150_v44 = vsel %vm1139_vm4, nan, %v1149_v56  ;;  %vm1243_vm13 = vweird.f32 %v3329_v13  ;;  %v1248_v57 = vxor.u32 2147483648, %v2564_v26 }
 0x270   :  { %2436 = vmatmul.mubr.msk.f32.gmra.mxu1 %vm605_vm1, %v1150_v44  ;;  %v1342_v7 = vsel %vm1257_vm10, %v1341_v58, %v3468_v33  ;;  %v1245_v23 = vand.u32 3, %v1244_v5  ;;  %v1251_v2 = vxor.u32 2147483648, %v3708_v50  ;;  %v1547_v31 = vxor.u32 2147483648, %v1546_v10 }
 0x271   :  { %vm2275_vm2 = vcmp.lt.s32.totalorder %v2274_v38, 0  ;;  %v1344_v48 = vsel %vm3547_vm3, 0, %v1342_v7  ;;  %v1352_v18 = vxor.u32 2147483648, %v2566_v42  ;;  %v1355_v6 = vxor.u32 2147483648, %v3698_v36 }
 0x272   :  { %v1430_v17 = vsel %vm2275_vm2, 0, %v2274_v38  ;;  %v1348_v55 = vadd.s32 3, %v1344_v48  ;;  %vm1246_vm11 = vcmp.lt.s32.totalorder %v1245_v23, 2  ;;  %vm1247_vm8 = vcmp.eq.s32.totalorder %v1245_v23, 0 }
 0x273   :  { %v1431_v59 = vsub.s32 32, %v1430_v17  ;;  %v1432_v53 = vshll.u32 %v3710_v21, %v1430_v17  ;;  %v1435_v37 = vsub.s32 4294967266, %v1430_v17  ;;  %vm1250_vm10 = vcmp.eq.s32.totalorder %v1245_v23, 2 }
 0x274   :  { %v1349_v33 = vand.u32 3, %v1348_v55  ;;  %v1249_v32 = vsel %vm1247_vm8, %v3708_v50, %v1248_v57  ;;  %v1252_v45 = vsel %vm1250_vm10, %v1251_v2, %v2564_v26  ;;  %v1548_v47 = vsel %vm1465_vm15, %v1547_v31, %v1546_v10 }
 0x275   :  { %v1433_v49 = vshrl.u32 %v1415_v20, %v1431_v59  ;;  %v1436_v24 = vadd.s32 127, %v1435_v37  ;;  %v1253_v30 = vsel %vm1246_vm11, %v1249_v32, %v1252_v45  ;;  %v3933_v52 = vand.u32 2147483647, %v3357_v54  ;;  %v1832_v37 = vld [vmem:[%s3909_s8 + $0x18] sm:$0xff] }
 0x276   :  { %vm1351_vm3 = vcmp.eq.s32.totalorder %v1349_v33, 0  ;;  %vm1354_vm14 = vcmp.eq.s32.totalorder %v1349_v33, 2  ;;  %v1254_v11 = vsel %vm1243_vm13, nan, %v1253_v30  ;;  %vm1350_vm7 = vcmp.lt.s32.totalorder %v1349_v33, 2  ;;  %2444 = vmatprep.subr.mxu0 %v1832_v37 }
 0x277   :  { %v1434_v35 = vor.u32 %v1433_v49, %v1432_v53  ;;  %v1437_v34 = vshll.u32 %v1436_v24, 23  ;;  %v1353_v4 = vsel %vm1351_vm3, %v3698_v36, %v1352_v18  ;;  %vm3756_vm0 = vcmp.le.f32.partialorder %v3933_v52, 0.7853982  ;;  %2438 = vmatprep.mubr.msk.f32.mxu1 %vm605_vm1, %v1254_v11  ;;  %2445 = vmatpush3.msra.mxu0 %v1832_v37  ;;  %v1830_v24 = vld [vmem:[%s3909_s8 + $0x8] sm:$0xff] }
 0x278   :  { %v1356_v50 = vsel %vm1354_vm14, %v1355_v6, %v2566_v42  ;;  %v1551_v41 = vsel %vm3756_vm0, %v3357_v54, %v1548_v47  ;;  %vm1347_vm9 = vweird.f32 %v3219_v16  ;;  %v1549_v1 = vsub.s32 4, %v3617_v39  ;;  %v1831_v6 = vld [vmem:[%s3909_s8 + $0x10] sm:$0xff] }
 0x279   :  { %v1438_v21 = vor.u32 4788187, %v1437_v34  ;;  %v1357_v13 = vsel %vm1350_vm7, %v1353_v4, %v1356_v50  ;;  %v1441_v60 = vcvt.s32.f32 %v1434_v35  ;;  %2567 = vcosq.f32 %v1551_v41  ;;  %2446 = vmatprep.subr.mxu0 %v1831_v6  ;;  %v1829_v35 = vld [vmem:[%s3909_s8] sm:$0xff] }
 0x27a   :  { %v1358_v27 = vsel %vm1347_vm9, nan, %v1357_v13  ;;  %2569 = vsinq.f32 %v1551_v41  ;;  %vm1361_vm4 = vcmp.lt.s32.totalorder %v3364_v51, 0  ;;  %v1445_v9 = vsub.s32 4, %v3692_v0  ;;  %2447 = vmatpush3.msra.mxu0 %v1831_v6 }
 0x27b   :  { %v1439_v36 = vand.u32 2147483647, %v1438_v21  ;;  %2439 = vmatmul.mubr.msk.f32.gmra.mxu1 %vm605_vm1, %v1358_v27  ;;  %v3936_v22 = vand.u32 2147483647, %v3364_v51  ;;  %v1550_v15 = vsel %vm1465_vm15, %v1549_v1, %v3617_v39  ;;  %vm1451_vm8 = vweird.f32 %v3364_v51  ;;  %2448 = vmatprep.subr.mxu0 %v1830_v24 }
 0x27c   :  { %v1446_v25 = vsel %vm1361_vm4, %v1445_v9, %v3692_v0  ;;  %v1552_v28 = vsel %vm3756_vm0, 0, %v1550_v15  ;;  %vm1555_vm10 = vweird.f32 %v3357_v54  ;;  %vm1700_vm3 = vcmask 523264   ;;  %2449 = vmatpush3.msra.mxu0 %v1830_v24  ;;  %v2288_v24 = vld [vmem:[%s3910_s7] ss:$0 sm:$0xff] }
 0x27d   :  { %v1442_v61 = vmul.f32 %v1441_v60, %v1439_v36  ;;  %vm1360_vm6 = vcmp.le.f32.partialorder %v3936_v22, 0.7853982  ;;  %v1556_v19 = vadd.s32 3, %v1552_v28  ;;  %2450 = vmatprep.subr.mxu0 %v1829_v35  ;;  %vm2583_vm14 = vmmov 0  }
 0x27e   :  { %v1448_v26 = vsel %vm1360_vm6, 0, %v1446_v25  ;;  %2451 = vmatpush3.msra.mxu0 %v1829_v35  ;;  %vm2052_vm0 = vcmask 1041409   ;;  %vm2054_vm7 = vcmask 1042434   ;;  %vm2056_vm9 = vcmask 1043459  }
 0x27f   :  { %v1443_v43 = vxor.u32 2147483648, %v1442_v61  ;;  %v1452_v40 = vadd.s32 3, %v1448_v26  ;;  %v1557_v12 = vand.u32 3, %v1556_v19 }
 0x281   :  { %v1444_v16 = vsel %vm1361_vm4, %v1443_v43, %v1442_v61  ;;  %v1453_v10 = vand.u32 3, %v1452_v40  ;;  %vm1559_vm12 = vcmp.eq.s32.totalorder %v1557_v12, 0  ;;  %vm1562_vm5 = vcmp.eq.s32.totalorder %v1557_v12, 2 }
 0x282   :  { %v1447_v63 = vsel %vm1360_vm6, %v3364_v51, %v1444_v16  ;;  %vm1558_vm2 = vcmp.lt.s32.totalorder %v1557_v12, 2  ;;  %vm2058_vm4 = vcmask 1044484   ;;  %vm2060_vm6 = vcmask 1045509  }
 0x283   :  { %2571 = vcosq.f32 %v1447_v63  ;;  %vm1458_vm15 = vcmp.eq.s32.totalorder %v1453_v10, 2  ;;  %vm1455_vm13 = vcmp.eq.s32.totalorder %v1453_v10, 0  ;;  %vm1454_vm11 = vcmp.lt.s32.totalorder %v1453_v10, 2 }
 0x284   :  { %2573 = vsinq.f32 %v1447_v63 }
 0x286   :  { %v2568_v8 = vpop.eup %2567 }
 0x287   :  { %v2570_v62 = vpop.eup %2569  ;;  %v1563_v46 = vxor.u32 2147483648, %v2568_v8 }
 0x288   :  { %v1560_v3 = vxor.u32 2147483648, %v2570_v62 }
 0x289   :  { %v1564_v42 = vsel %vm1562_vm5, %v1563_v46, %v2570_v62  ;;  %vm2064_vm5 = vcmask 1047559  }
 0x28a   :  { %v1561_v58 = vsel %vm1559_vm12, %v2568_v8, %v1560_v3  ;;  %vm2062_vm12 = vcmask 1046534  }
 0x28b   :  { %v1565_v5 = vsel %vm1558_vm2, %v1561_v58, %v1564_v42 }
 0x28c   :  { %v1566_v7 = vsel %vm1555_vm10, nan, %v1565_v5 }
 0x290   :  { %v2572_v56 = vpop.eup %2571 }
 0x291   :  { %v2574_v39 = vpop.eup %2573  ;;  %v1459_v14 = vxor.u32 2147483648, %v2572_v56 }
 0x292   :  { %v1456_v0 = vxor.u32 2147483648, %v2574_v39 }
 0x293   :  { %v1460_v38 = vsel %vm1458_vm15, %v1459_v14, %v2574_v39  ;;  %vm2223_vm15 = vcmask 15360  }
 0x294   :  { %v1457_v44 = vsel %vm1455_vm13, %v2572_v56, %v1456_v0 }
 0x295   :  { %v1461_v20 = vsel %vm1454_vm11, %v1457_v44, %v1460_v38 }
 0x296   :  { %v1462_v57 = vsel %vm1451_vm8, nan, %v1461_v20 }
 0x297   :  { %2441 = vmatprep.mubr.msk.f32.mxu1 %vm605_vm1, %v1462_v57 }
 0x298   :  { %2442 = vmatmul.mubr.msk.f32.gmra.mxu1 %vm605_vm1, %v1566_v7 }
 0x325   :  { %v3782_v23 = vpop.f32.mrf.mxu1 }
 0x326   :  { %v1708_v2 = vsel %vm1700_vm3, %v3782_v23, 0.0 }
 0x327   :  { %v1709_v48 = vrot.slane %v1708_v2, 4  ;;  %v3786_v31 = vpop.f32.mrf.mxu1 }
 0x328   :  { %v1701_v51 = vsel %vm1700_vm3, %v3786_v31, 0.0 }
 0x329   :  { %v1710_v17 = vadd.f32 %v1709_v48, %v1708_v2  ;;  %v1702_v55 = vrot.slane %v1701_v51, 4 }
 0x32b   :  { %v1711_v54 = vrot.slane %v1710_v17, 2  ;;  %v1703_v18 = vadd.f32 %v1702_v55, %v1701_v51 }
 0x32d   :  { %v1712_v59 = vadd.f32 %v1711_v54, %v1710_v17  ;;  %v1704_v53 = vrot.slane %v1703_v18, 2 }
 0x32f   :  { %v1705_v33 = vadd.f32 %v1704_v53, %v1703_v18  ;;  %v1713_v49 = vrot.slane %v1712_v59, 1 }
 0x330   :  { %v3799_v32 = vpop.f32.mrf.mxu1 }
 0x331   :  { %v1722_v45 = vsel %vm1700_vm3, %v3799_v32, 0.0  ;;  %v1714_v47 = vadd.f32 %v1713_v49, %v1712_v59  ;;  %v1706_v30 = vrot.slane %v1705_v33, 1 }
 0x332   :  { %v1723_v34 = vrot.slane %v1722_v45, 4  ;;  %v3806_v11 = vpop.f32.mrf.mxu1 }
 0x333   :  { %v1715_v4 = vsel %vm1700_vm3, %v3806_v11, 0.0  ;;  %v1759_v52 = vmul.f32 0.125, %v1714_v47  ;;  %v1707_v29 = vadd.f32 %v1706_v30, %v1705_v33 }
 0x334   :  { %v1724_v50 = vadd.f32 %v1723_v34, %v1722_v45  ;;  %v1716_v41 = vrot.slane %v1715_v4, 4 }
 0x335   :  { %1776 = vrot.lane.b32.xlu1 %v1759_v52, %s2582_s20  ;;  %v1758_v21 = vmul.f32 0.125, %v1707_v29 }
 0x336   :  { %v1725_v13 = vrot.slane %v1724_v50, 2  ;;  %v1717_v27 = vadd.f32 %v1716_v41, %v1715_v4 }
 0x337   :  { %1774 = vrot.lane.b32.xlu0 %v1758_v21, %s2582_s20 }
 0x338   :  { %v1726_v36 = vadd.f32 %v1725_v13, %v1724_v50  ;;  %v1718_v60 = vrot.slane %v1717_v27, 2 }
 0x33a   :  { %v1719_v61 = vadd.f32 %v1718_v60, %v1717_v27  ;;  %v1727_v22 = vrot.slane %v1726_v36, 1 }
 0x33b   :  { %v3812_v1 = vpop.f32.mrf.mxu1 }
 0x33c   :  { %v1736_v43 = vsel %vm1700_vm3, %v3812_v1, 0.0  ;;  %v1720_v9 = vrot.slane %v1719_v61, 1  ;;  %v1728_v8 = vadd.f32 %v1727_v22, %v1726_v36 }
 0x33d   :  { %v1737_v16 = vrot.slane %v1736_v43, 4  ;;  %v3816_v63 = vpop.f32.mrf.mxu1 }
 0x33e   :  { %v1729_v15 = vsel %vm1700_vm3, %v3816_v63, 0.0  ;;  %v1721_v25 = vadd.f32 %v1720_v9, %v1719_v61  ;;  %v1761_v46 = vmul.f32 0.125, %v1728_v8 }
 0x33f   :  { %v1738_v28 = vadd.f32 %v1737_v16, %v1736_v43  ;;  %v1730_v26 = vrot.slane %v1729_v15, 4 }
 0x340   :  { %v1760_v19 = vmul.f32 0.125, %v1721_v25 }
 0x341   :  { %v1739_v62 = vrot.slane %v1738_v28, 2  ;;  %v1731_v40 = vadd.f32 %v1730_v26, %v1729_v15 }
 0x342   :  { %1778 = vrot.lane.b32.xlu1 %v1760_v19, %s2582_s20 }
 0x343   :  { %v1740_v12 = vadd.f32 %v1739_v62, %v1738_v28  ;;  %v1732_v3 = vrot.slane %v1731_v40, 2  ;;  %v2035_v62 = vld [vmem:[%s3911_s10 + $0x10] sm:$0xff] }
 0x345   :  { %v1733_v10 = vadd.f32 %v1732_v3, %v1731_v40  ;;  %v1741_v56 = vrot.slane %v1740_v12, 1  ;;  %v3937_v40 = vmov 0.0   ;;  %v2033_v3 = vld [vmem:[%s3911_s10] sm:$0xff] }
 0x346   :  { %1780 = vrot.lane.b32.xlu1 %v1761_v46, %s2582_s20  ;;  %2472 = vmatprep.mubr.msk.f32.mxu1 %vm2583_vm14, %v3937_v40 }
 0x347   :  { %v1742_v39 = vadd.f32 %v1741_v56, %v1740_v12  ;;  %v1734_v14 = vrot.slane %v1733_v10, 1  ;;  %v2034_v12 = vld [vmem:[%s3911_s10 + $0x8] sm:$0xff] }
 0x349   :  { %v1763_v58 = vmul.f32 0.125, %v1742_v39  ;;  %v1735_v42 = vadd.f32 %v1734_v14, %v1733_v10 }
 0x34b   :  { %1784 = vrot.lane.b32.xlu1 %v1763_v58, %s2582_s20  ;;  %v1762_v0 = vmul.f32 0.125, %v1735_v42  ;;  %v2289_v58 = vld [vmem:[%s3912_s9] ss:$0 sm:$0xff] }
 0x34d   :  { %1782 = vrot.lane.b32.xlu0 %v1762_v0, %s2582_s20 }
 0x358   :  { %v2443_v38 = vpop.f32.mrf.mxu1 }
 0x359   :  { %v1750_v44 = vsel %vm1700_vm3, %v2443_v38, 0.0 }
 0x35a   :  { %v1751_v5 = vrot.slane %v1750_v44, 4  ;;  %v1691_v20 = vpop.f32.mrf.mxu1 }
 0x35b   :  { %v1743_v57 = vsel %vm1700_vm3, %v1691_v20, 0.0 }
 0x35c   :  { %v1752_v7 = vadd.f32 %v1751_v5, %v1750_v44  ;;  %v1744_v2 = vrot.slane %v1743_v57, 4 }
 0x35e   :  { %v1753_v48 = vrot.slane %v1752_v7, 2  ;;  %v1745_v51 = vadd.f32 %v1744_v2, %v1743_v57 }
 0x360   :  { %v1754_v17 = vadd.f32 %v1753_v48, %v1752_v7  ;;  %v1746_v55 = vrot.slane %v1745_v51, 2 }
 0x362   :  { %v1747_v54 = vadd.f32 %v1746_v55, %v1745_v51  ;;  %v1755_v18 = vrot.slane %v1754_v17, 1 }
 0x364   :  { %v1756_v59 = vadd.f32 %v1755_v18, %v1754_v17  ;;  %v1748_v53 = vrot.slane %v1747_v54, 1 }
 0x366   :  { %v1765_v37 = vmul.f32 0.125, %v1756_v59  ;;  %v1749_v6 = vadd.f32 %v1748_v53, %v1747_v54 }
 0x368   :  { %1788 = vrot.lane.b32.xlu1 %v1765_v37, %s2582_s20  ;;  %v1764_v33 = vmul.f32 0.125, %v1749_v6 }
 0x36a   :  { %1786 = vrot.lane.b32.xlu0 %v1764_v33, %s2582_s20 }
 0x3a7   :  { %v1777_v49 = vpop.permute.xlu1 %1776 }
 0x3a8   :  { %v1799_v45 = vadd.f32 %v3782_v23, %v1777_v49 }
 0x3a9   :  { %v1775_v47 = vpop.permute.xlu0 %1774 }
 0x3aa   :  { %v1798_v30 = vadd.f32 %v1775_v47, %v3786_v31  ;;  %v1814_v35 = vadd.f32 %v2288_v24, %v1799_v45 }
 0x3ac   :  { %v1813_v34 = vadd.f32 %v2288_v24, %v1798_v30  ;;  %v1822_v52 = vmax.f32 %v1814_v35, 0.0 }
 0x3ae   :  { %v1821_v4 = vmax.f32 %v1813_v34, 0.0 }
 0x3b0   :  { %2452 = vmatprep.mubr.msk.f32.mxu0 %vm605_vm1, %v1821_v4 }
 0x3b1   :  { %2453 = vmatmul.mubr.msk.f32.vlgmr.msra.gmra.mxu0 %vm605_vm1, %v1822_v52 }
 0x3b4   :  { %v1779_v29 = vpop.permute.xlu1 %1778 }
 0x3b5   :  { %v1800_v50 = vadd.f32 %v1779_v29, %v3806_v11 }
 0x3b7   :  { %v1815_v41 = vadd.f32 %v2288_v24, %v1800_v50 }
 0x3b8   :  { %v1781_v21 = vpop.permute.xlu1 %1780 }
 0x3b9   :  { %v1823_v13 = vmax.f32 %v1815_v41, 0.0  ;;  %v1801_v27 = vadd.f32 %v3799_v32, %v1781_v21 }
 0x3bb   :  { %v1816_v23 = vadd.f32 %v2288_v24, %v1801_v27  ;;  %2455 = vmatprep.mubr.msk.f32.mxu0 %vm605_vm1, %v1823_v13 }
 0x3bd   :  { %v1824_v31 = vmax.f32 %v1816_v23, 0.0  ;;  %v1785_v36 = vpop.permute.xlu1 %1784 }
 0x3be   :  { %v1803_v60 = vadd.f32 %v3812_v1, %v1785_v36 }
 0x3bf   :  { %v1783_v61 = vpop.permute.xlu0 %1782  ;;  %2456 = vmatmul.mubr.msk.f32.gmra.mxu0 %vm605_vm1, %v1824_v31 }
 0x3c0   :  { %v1818_v43 = vadd.f32 %v2288_v24, %v1803_v60  ;;  %v1802_v9 = vadd.f32 %v1783_v61, %v3816_v63  ;;  %v2036_v63 = vld [vmem:[%s3911_s10 + $0x18] sm:$0xff] }
 0x3c1   :  { %2465 = vmatpush3.msra.mxu1 %v2036_v63 }
 0x3c2   :  { %v1817_v22 = vadd.f32 %v2288_v24, %v1802_v9  ;;  %v1826_v11 = vmax.f32 %v1818_v43, 0.0  ;;  %2466 = vmatprep.subr.mxu1 %v3937_v40 }
 0x3c3   :  { %2467 = vmatpush3.msra.mxu1 %v2035_v62 }
 0x3c4   :  { %v1825_v16 = vmax.f32 %v1817_v22, 0.0  ;;  %2468 = vmatprep.subr.mxu1 %v3937_v40 }
 0x3c5   :  { %2469 = vmatpush3.msra.mxu1 %v2034_v12 }
 0x3c6   :  { %2458 = vmatprep.mubr.msk.f32.mxu0 %vm605_vm1, %v1825_v16  ;;  %2470 = vmatprep.subr.mxu1 %v3937_v40 }
 0x3c7   :  { %2459 = vmatmul.mubr.msk.f32.gmra.mxu0 %vm605_vm1, %v1826_v11  ;;  %2471 = vmatpush3.msra.mxu1 %v2033_v3 }
 0x3c8   :  { %2475 = vmatprep.subr.mxu1 %v3937_v40 }
 0x3da   :  { %v1789_v32 = vpop.permute.xlu1 %1788 }
 0x3db   :  { %v1805_v15 = vadd.f32 %v2443_v38, %v1789_v32 }
 0x3dc   :  { %v1787_v25 = vpop.permute.xlu0 %1786 }
 0x3dd   :  { %v1804_v28 = vadd.f32 %v1787_v25, %v1691_v20  ;;  %v1820_v26 = vadd.f32 %v2288_v24, %v1805_v15 }
 0x3df   :  { %v1819_v19 = vadd.f32 %v2288_v24, %v1804_v28  ;;  %v1828_v8 = vmax.f32 %v1820_v26, 0.0 }
 0x3e1   :  { %v1827_v1 = vmax.f32 %v1819_v19, 0.0 }
 0x3e3   :  { %2461 = vmatprep.mubr.msk.f32.mxu0 %vm605_vm1, %v1827_v1 }
 0x3e4   :  { %2462 = vmatmul.mubr.msk.f32.gmra.mxu0 %vm605_vm1, %v1828_v8 }
 0x471   :  { %v2454_v46 = vpop.f32.mrf.mxu0 }
 0x472   :  { %v1936_v38 = vadd.f32 %v2454_v46, %v2289_v58 }
 0x473   :  { %v1930_v10 = vpop.f32.mrf.mxu0 }
 0x474   :  { %v1931_v42 = vadd.f32 %v2289_v58, %v1930_v10  ;;  %v1976_v7 = vsel %vm605_vm1, %v1936_v38, 0.0 }
 0x475   :  { %v1977_v17 = vrot.slane %v1976_v7, 4 }
 0x476   :  { %v1969_v5 = vsel %vm605_vm1, %v1931_v42, 0.0 }
 0x477   :  { %v1970_v48 = vrot.slane %v1969_v5, 4  ;;  %v1978_v6 = vadd.f32 %v1977_v17, %v1976_v7 }
 0x479   :  { %v1971_v59 = vadd.f32 %v1970_v48, %v1969_v5  ;;  %v1979_v30 = vrot.slane %v1978_v6, 2 }
 0x47b   :  { %v1972_v24 = vrot.slane %v1971_v59, 2  ;;  %v1980_v50 = vadd.f32 %v1979_v30, %v1978_v6  ;;  %v2142_v6 = vld [vmem:[%s3913_s12 + $0x18] sm:$0xff] }
 0x47d   :  { %v1973_v4 = vadd.f32 %v1972_v24, %v1971_v59  ;;  %v1981_v36 = vrot.slane %v1980_v50, 1  ;;  %v2140_v24 = vld [vmem:[%s3913_s12 + $0x8] sm:$0xff] }
 0x47f   :  { %v2457_v56 = vpop.f32.mrf.mxu0  ;;  %v1974_v13 = vrot.slane %v1973_v4, 1  ;;  %v1982_v28 = vadd.f32 %v1981_v36, %v1980_v50 }
 0x480   :  { %v1946_v2 = vadd.f32 %v2457_v56, %v2289_v58 }
 0x481   :  { %v1940_v39 = vpop.f32.mrf.mxu0  ;;  %v1975_v22 = vadd.f32 %v1974_v13, %v1973_v4  ;;  %v2026_v56 = vmul.f32 0.125, %v1982_v28 }
 0x482   :  { %v1941_v0 = vadd.f32 %v2289_v58, %v1940_v39  ;;  %v1990_v54 = vsel %vm605_vm1, %v1946_v2, 0.0 }
 0x483   :  { %v1991_v33 = vrot.slane %v1990_v54, 4  ;;  %v2025_v62 = vmul.f32 0.125, %v1975_v22 }
 0x484   :  { %v1983_v20 = vsel %vm605_vm1, %v1941_v0, 0.0 }
 0x485   :  { %v1984_v51 = vrot.slane %v1983_v20, 4  ;;  %v1992_v35 = vadd.f32 %v1991_v33, %v1990_v54  ;;  %v2053_v0 = vsel %vm2052_vm0, %v2026_v56, %v2025_v62 }
 0x487   :  { %v2460_v14 = vpop.f32.mrf.mxu0  ;;  %v1985_v53 = vadd.f32 %v1984_v51, %v1983_v20  ;;  %v1993_v41 = vrot.slane %v1992_v35, 2 }
 0x488   :  { %v1956_v18 = vadd.f32 %v2460_v14, %v2289_v58 }
 0x489   :  { %v1950_v44 = vpop.f32.mrf.mxu0  ;;  %v1986_v45 = vrot.slane %v1985_v53, 2  ;;  %v1994_v60 = vadd.f32 %v1993_v41, %v1992_v35 }
 0x48a   :  { %v1951_v57 = vadd.f32 %v2289_v58, %v1950_v44  ;;  %v2004_v49 = vsel %vm605_vm1, %v1956_v18, 0.0 }
 0x48b   :  { %v2005_v34 = vrot.slane %v2004_v49, 4  ;;  %v1987_v52 = vadd.f32 %v1986_v45, %v1985_v53  ;;  %v1995_v26 = vrot.slane %v1994_v60, 1  ;;  %v2139_v45 = vld [vmem:[%s3913_s12] sm:$0xff] }
 0x48c   :  { %v1997_v55 = vsel %vm605_vm1, %v1951_v57, 0.0 }
 0x48d   :  { %v1998_v37 = vrot.slane %v1997_v55, 4  ;;  %v2006_v21 = vadd.f32 %v2005_v34, %v2004_v49  ;;  %v1988_v27 = vrot.slane %v1987_v52, 1  ;;  %v1996_v39 = vadd.f32 %v1995_v26, %v1994_v60  ;;  %v2141_v49 = vld [vmem:[%s3913_s12 + $0x10] sm:$0xff] }
 0x48f   :  { %v1999_v47 = vadd.f32 %v1998_v37, %v1997_v55  ;;  %v2007_v61 = vrot.slane %v2006_v21, 2  ;;  %v1989_v32 = vadd.f32 %v1988_v27, %v1987_v52  ;;  %v2028_v57 = vmul.f32 0.125, %v1996_v39  ;;  %v2300_v52 = vld [vmem:[%s3915_s13] ss:$0 sm:$0xff] }
 0x491   :  { %v2000_v29 = vrot.slane %v1999_v47, 2  ;;  %v2008_v19 = vadd.f32 %v2007_v61, %v2006_v21  ;;  %v2027_v12 = vmul.f32 0.125, %v1989_v32 }
 0x493   :  { %v2001_v23 = vadd.f32 %v2000_v29, %v1999_v47  ;;  %v2009_v14 = vrot.slane %v2008_v19, 1  ;;  %v2055_v38 = vsel %vm2054_vm7, %v2027_v12, %v2053_v0  ;;  %v2298_v47 = vld [vmem:[%s3914_s11] ss:$0 sm:$0xff] }
 0x494   :  { %v2057_v48 = vsel %vm2056_vm9, %v2028_v57, %v2055_v38 }
 0x495   :  { %v2002_v15 = vrot.slane %v2001_v23, 1  ;;  %v2010_v7 = vadd.f32 %v2009_v14, %v2008_v19 }
 0x497   :  { %v2003_v3 = vadd.f32 %v2002_v15, %v2001_v23  ;;  %v2030_v54 = vmul.f32 0.125, %v2010_v7 }
 0x499   :  { %v2029_v44 = vmul.f32 0.125, %v2003_v3 }
 0x49b   :  { %v2059_v17 = vsel %vm2058_vm4, %v2029_v44, %v2057_v48 }
 0x49c   :  { %v2061_v53 = vsel %vm2060_vm6, %v2030_v54, %v2059_v17 }
 0x4a4   :  { %v2463_v31 = vpop.f32.mrf.mxu0 }
 0x4a5   :  { %v1966_v43 = vadd.f32 %v2463_v31, %v2289_v58 }
 0x4a6   :  { %v1960_v9 = vpop.f32.mrf.mxu0 }
 0x4a7   :  { %v2018_v11 = vsel %vm605_vm1, %v1966_v43, 0.0  ;;  %v1961_v16 = vadd.f32 %v2289_v58, %v1960_v9 }
 0x4a8   :  { %v2019_v25 = vrot.slane %v2018_v11, 4 }
 0x4a9   :  { %v2011_v1 = vsel %vm605_vm1, %v1961_v16, 0.0 }
 0x4aa   :  { %v2020_v8 = vadd.f32 %v2019_v25, %v2018_v11  ;;  %v2012_v63 = vrot.slane %v2011_v1, 4 }
 0x4ac   :  { %v2021_v46 = vrot.slane %v2020_v8, 2  ;;  %v2013_v10 = vadd.f32 %v2012_v63, %v2011_v1 }
 0x4ae   :  { %v2022_v58 = vadd.f32 %v2021_v46, %v2020_v8  ;;  %v2014_v42 = vrot.slane %v2013_v10, 2 }
 0x4b0   :  { %v2023_v5 = vrot.slane %v2022_v58, 1  ;;  %v2015_v20 = vadd.f32 %v2014_v42, %v2013_v10 }
 0x4b2   :  { %v2016_v2 = vrot.slane %v2015_v20, 1  ;;  %v2024_v51 = vadd.f32 %v2023_v5, %v2022_v58 }
 0x4b4   :  { %v2017_v55 = vadd.f32 %v2016_v2, %v2015_v20  ;;  %v2032_v59 = vmul.f32 0.125, %v2024_v51 }
 0x4b6   :  { %v2031_v18 = vmul.f32 0.125, %v2017_v55 }
 0x4b8   :  { %v2063_v37 = vsel %vm2062_vm12, %v2031_v18, %v2061_v53 }
 0x4b9   :  { %v2065_v33 = vsel %vm2064_vm5, %v2032_v59, %v2063_v37 }
 0x4ba   :  { %2473 = vmatmul.mubr.msk.f32.vlgmr.msra.gmra.mxu1 %vm605_vm1, %v2065_v33 }
 0x4bb   :  { %2476 = vmatpush3.msra.mxu1 %v2142_v6  ;;  %2483 = vmatprep.mubr.msk.f32.mxu1 %vm2583_vm14, %v3937_v40 }
 0x4bc   :  { %2477 = vmatprep.subr.mxu1 %v3937_v40 }
 0x4bd   :  { %2478 = vmatpush3.msra.mxu1 %v2141_v49 }
 0x4be   :  { %2479 = vmatprep.subr.mxu1 %v3937_v40 }
 0x4bf   :  { %2480 = vmatpush3.msra.mxu1 %v2140_v24 }
 0x4c0   :  { %2481 = vmatprep.subr.mxu1 %v3937_v40 }
 0x4c1   :  { %2482 = vmatpush3.msra.mxu1 %v2139_v45 }
 0x57a   :  { %v2134_v30 = vpop.f32.mrf.mxu1 }
 0x57b   :  { %v2135_v35 = vadd.f32 %v2298_v47, %v2134_v30 }
 0x57c   :  { %v2474_v34 = vpop.f32.mrf.mxu1 }
 0x57d   :  { %v2138_v4 = vmax.f32 %v2135_v35, 0.0 }
 0x57f   :  { %2484 = vmatmul.mubr.msk.f32.vlgmr.msra.gmra.mxu1 %vm605_vm1, %v2138_v4 }
 0x63f   :  { %v2219_v29 = vpop.f32.mrf.mxu1 }
 0x640   :  { %v2220_v50 = vadd.f32 %v2300_v52, %v2219_v29 }
 0x641   :  { %v2485_v41 = vpop.f32.mrf.mxu1 }
 0x642   :  { %2224 = vst.msk [vmem:[%s3916_s14] sm:$0xff] %vm2223_vm15, %v2220_v50 }

</bundles_post_ra>
